<compile_context>
chip_gen: v7x
topology: tpu7x:2x2x1
jax: 0.10.0
libtpu: 0.0.40
codegen_flags: <defaults>
</compile_context>

<pallas_src>
import functools

import numpy as np
import jax
import jax.numpy as jnp
from jax import lax
from jax.experimental import pallas as pl
from jax.experimental.pallas import tpu as pltpu

LN_EPS = 1e-5


# ----------------------------------------------------------------------------
# Fused kernel (one grid step = B batch samples).
#   x_ref    : (B, Cin, P)  mxu_dtype
#   w1_ref   : (F, Cin)     mxu_dtype   1x1 conv weights
#   b1_ref   : (F, 1)       f32
#   g1/be1   : (F, P)       f32         LayerNorm1 affine (flattened C,H,W)
#   w2s_ref  : (G, 9F)      mxu_dtype   3x3 conv weights, column block k = tap k
#   b2_ref   : (G, 1)       f32
#   g2/be2   : (G, P)       f32         LayerNorm2 affine
#   mask_ref : (9, 1, P)    f32         0/1 edge masks per tap (zero padding)
#   o_ref    : (B, G, P)    f32
#   hstk_ref : (9F, P)      mxu_dtype   VMEM scratch: stacked rolled/masked h
# ----------------------------------------------------------------------------
def _dense_layer_kernel(x_ref, w1_ref, b1_ref, g1_ref, be1_ref,
                        w2s_ref, b2_ref, g2_ref, be2_ref, mask_ref,
                        o_ref, hstk_ref, *, W):
    B = x_ref.shape[0]
    F, P = g1_ref.shape
    G = g2_ref.shape[0]
    mxu_dtype = hstk_ref.dtype

    w1 = w1_ref[...]
    w2s = w2s_ref[...]
    b1 = b1_ref[...]
    b2 = b2_ref[...]
    g1 = g1_ref[...]
    be1 = be1_ref[...]
    g2 = g2_ref[...]
    be2 = be2_ref[...]

    inv_n1 = 1.0 / (F * P)
    inv_n2 = 1.0 / (G * P)

    for b in range(B):                                       # static unroll
        # ---- conv1 (1x1) + bias:  one MXU matmul ---------------------------
        h = jnp.dot(w1, x_ref[b], preferred_element_type=jnp.float32) + b1

        # ---- LayerNorm1 over the (F, P) slab + ReLU (f32, one-pass stats) --
        # TODO(synk): at very large F*P switch to centered two-pass variance.
        m1 = jnp.sum(h) * inv_n1
        v1 = jnp.maximum(jnp.sum(h * h) * inv_n1 - m1 * m1, 0.0)
        h = (h - m1) * lax.rsqrt(v1 + LN_EPS)
        h = jnp.maximum(h * g1 + be1, 0.0)                   # (F, P), resident

        # ---- conv2 (3x3 'same'): build stacked (9F, P) taps, ONE matmul ----
        for k in range(9):                                   # static unroll
            dh, dw = k // 3 - 1, k % 3 - 1
            # hs[p] = h[p + dh*W + dw]  (masked to emulate zero padding and
            # kill the circular wrap of the roll)
            shift = (-(dh * W + dw)) % P
            hs = h if shift == 0 else pltpu.roll(h, shift, axis=1)
            if k != 4:                                       # center mask == 1
                hs = hs * mask_ref[k]
            hstk_ref[pl.ds(k * F, F), :] = hs.astype(mxu_dtype)

        acc = jnp.dot(w2s, hstk_ref[...],
                      preferred_element_type=jnp.float32) + b2   # (G, P)

        # ---- LayerNorm2 + ReLU ---------------------------------------------
        m2 = jnp.sum(acc) * inv_n2
        v2 = jnp.maximum(jnp.sum(acc * acc) * inv_n2 - m2 * m2, 0.0)
        y = (acc - m2) * lax.rsqrt(v2 + LN_EPS)
        o_ref[b] = jnp.maximum(y * g2 + be2, 0.0)


def _tap_masks(H, W):
    """(9, 1, H*W) 0/1 masks: tap k = kh*3+kw is valid where the 3x3 'same'
    zero padding is NOT read (also kills the circular wrap of the roll)."""
    ii, jj = np.meshgrid(np.arange(H), np.arange(W), indexing="ij")
    ii = ii.reshape(-1)
    jj = jj.reshape(-1)
    m = np.zeros((9, 1, H * W), np.float32)
    for k in range(9):
        dh, dw = k // 3 - 1, k % 3 - 1
        m[k, 0] = ((ii + dh >= 0) & (ii + dh < H) &
                   (jj + dw >= 0) & (jj + dw < W)).astype(np.float32)
    return jnp.asarray(m)


def _pick_samples_per_step(n, max_b=8):
    """Largest divisor of n (<= max_b) keeping grid = n // B even (v7x)."""
    divisors = [b for b in range(1, min(n, max_b) + 1) if n % b == 0]
    even_grid = [b for b in divisors if (n // b) % 2 == 0]
    return max(even_grid) if even_grid else max(divisors)


def dense_layer_pallas(x, params, H, W, *, mxu_dtype=jnp.bfloat16,
                       samples_per_step=None):
    """One DenseLayer: conv1(1x1)+LN+ReLU, conv2(3x3,'same')+LN+ReLU, fused."""
    w1, b1, g1, be1, w2, b2, g2, be2 = params
    N, Cin, _, _ = x.shape
    P = H * W
    F = w1.shape[0]
    G = w2.shape[0]

    B = samples_per_step or _pick_samples_per_step(N)
    assert N % B == 0, (N, B)
    steps = N // B

    # MXU operands in mxu_dtype; everything elementwise stays f32.
    x2 = x.reshape(N, Cin, P).astype(mxu_dtype)
    w1f = w1.reshape(F, Cin).astype(mxu_dtype)
    # Stacked conv2 weights: column block k = kh*3+kw holds tap k's (G, F).
    w2s = jnp.transpose(w2, (0, 2, 3, 1)).reshape(G, 9 * F).astype(mxu_dtype)
    masks = _tap_masks(H, W)

    b1c = b1.reshape(F, 1).astype(jnp.float32)
    b2c = b2.reshape(G, 1).astype(jnp.float32)
    g1f = g1.reshape(F, P).astype(jnp.float32)
    be1f = be1.reshape(F, P).astype(jnp.float32)
    g2f = g2.reshape(G, P).astype(jnp.float32)
    be2f = be2.reshape(G, P).astype(jnp.float32)

    # --- explicit VMEM budget (v5e default scoped limit is only 16 MiB) ------
    mxu_bytes = jnp.dtype(mxu_dtype).itemsize
    resident = (2 * B * Cin * P * mxu_bytes            # x (double-buffered)
                + 2 * B * G * P * 4                    # out (double-buffered)
                + 2 * (F * Cin + 9 * G * F) * mxu_bytes
                + 2 * (F + G) * 4
                + 2 * 2 * (F + G) * P * 4              # gamma/beta slabs
                + 2 * 9 * P * 4                        # masks
                + 9 * F * P * mxu_bytes)               # stacked-h scratch
    vmem_limit = int(max(32 << 20, min(96 << 20, 2 * resident)))

    flops = N * (2 * F * Cin * P + 2 * G * 9 * F * P
                 + 10 * (F + G) * P + 18 * F * P)
    bytes_accessed = (x2.size * mxu_bytes + N * G * P * 4
                      + (w1f.size + w2s.size) * mxu_bytes
                      + 4 * (b1c.size + b2c.size + 2 * F * P + 2 * G * P
                             + masks.size))

    const2 = lambda n: (0, 0)
    const3 = lambda n: (0, 0, 0)

    out = pl.pallas_call(
        functools.partial(_dense_layer_kernel, W=W),
        out_shape=jax.ShapeDtypeStruct((N, G, P), jnp.float32),
        grid_spec=pltpu.PrefetchScalarGridSpec(
            num_scalar_prefetch=0,
            grid=(steps,),
            in_specs=[
                pl.BlockSpec((B, Cin, P), lambda n: (n, 0, 0)),   # x
                pl.BlockSpec((F, Cin), const2),                   # w1
                pl.BlockSpec((F, 1), const2),                     # b1
                pl.BlockSpec((F, P), const2),                     # gamma1
                pl.BlockSpec((F, P), const2),                     # beta1
                pl.BlockSpec((G, 9 * F), const2),                 # w2 stacked
                pl.BlockSpec((G, 1), const2),                     # b2
                pl.BlockSpec((G, P), const2),                     # gamma2
                pl.BlockSpec((G, P), const2),                     # beta2
                pl.BlockSpec((9, 1, P), const3),                  # edge masks
            ],
            out_specs=pl.BlockSpec((B, G, P), lambda n: (n, 0, 0)),
            scratch_shapes=[pltpu.VMEM((9 * F, P), mxu_dtype)],
        ),
        compiler_params=pltpu.CompilerParams(
            dimension_semantics=("parallel",),
            vmem_limit_bytes=vmem_limit),
        cost_estimate=pl.CostEstimate(
            flops=int(flops), transcendentals=2 * N,
            bytes_accessed=int(bytes_accessed)),
    )(x2, w1f, b1c, g1f, be1f, w2s, b2c, g2f, be2f, masks)

    return out.reshape(N, G, H, W)


# ----------------------------------------------------------------------------
# Pure-JAX reference (correctness check).  conv_dtype lets us build a
# bit-comparable reference for the bf16-operand MXU path.
# ----------------------------------------------------------------------------
def _ref_conv(x, w, b, conv_dtype):
    y = lax.conv_general_dilated(
        x.astype(conv_dtype), w.astype(conv_dtype),
        window_strides=(1, 1), padding="SAME",
        dimension_numbers=("NCHW", "OIHW", "NCHW"),
        preferred_element_type=jnp.float32,
        precision=lax.Precision.HIGHEST)
    return y + b[None, :, None, None]


def _ref_layernorm(y, g, b):
    mean = y.mean(axis=(1, 2, 3), keepdims=True)
    var = ((y - mean) ** 2).mean(axis=(1, 2, 3), keepdims=True)
    return (y - mean) / jnp.sqrt(var + LN_EPS) * g[None] + b[None]


def dense_layer_ref(x, params, conv_dtype=jnp.float32):
    w1, b1, g1, be1, w2, b2, g2, be2 = params
    y = jnp.maximum(_ref_layernorm(_ref_conv(x, w1, b1, conv_dtype), g1, be1), 0.0)
    y = jnp.maximum(_ref_layernorm(_ref_conv(y, w2, b2, conv_dtype), g2, be2), 0.0)
    return y


# ----------------------------------------------------------------------------
# Deterministic synthetic parameters (shapes follow the nn.Module __init__).
# ----------------------------------------------------------------------------
def init_dense_layer(key, in_ch, feature_maps, growth_rate, H, W):
    ks = jax.random.split(key, 8)
    w1 = 0.2 * jax.random.normal(ks[0], (feature_maps, in_ch, 1, 1), jnp.float32)
    b1 = 0.1 * jax.random.normal(ks[1], (feature_maps,), jnp.float32)
    g1 = 1.0 + 0.1 * jax.random.normal(ks[2], (feature_maps, H, W), jnp.float32)
    be1 = 0.1 * jax.random.normal(ks[3], (feature_maps, H, W), jnp.float32)
    w2 = 0.1 * jax.random.normal(ks[4], (growth_rate, feature_maps, 3, 3), jnp.float32)
    b2 = 0.1 * jax.random.normal(ks[5], (growth_rate,), jnp.float32)
    g2 = 1.0 + 0.1 * jax.random.normal(ks[6], (growth_rate, H, W), jnp.float32)
    be2 = 0.1 * jax.random.normal(ks[7], (growth_rate, H, W), jnp.float32)
    return (w1, b1, g1, be1, w2, b2, g2, be2)


if __name__ == "__main__":
    # N=4 so the auto batching picks B=2 samples/step -> grid=(2,), even.
    N, Cin, FM, GR, H, W = 4, 4, 8, 4, 16, 16

    key = jax.random.PRNGKey(0)
    kx, kp = jax.random.split(key)
    x = jax.random.normal(kx, (N, Cin, H, W), jnp.float32)
    params = init_dense_layer(kp, Cin, FM, GR, H, W)

    # ---- f32 MXU path: tight correctness check ------------------------------
    run_f32 = jax.jit(functools.partial(
        dense_layer_pallas, H=H, W=W, mxu_dtype=jnp.float32))
    out_f32 = jax.block_until_ready(run_f32(x, params))
    assert out_f32.shape == (N, GR, H, W), out_f32.shape
    ref_f32 = jax.block_until_ready(dense_layer_ref(x, params, jnp.float32))
    assert jnp.allclose(out_f32, ref_f32, rtol=1e-2, atol=1e-2), (
        float(jnp.max(jnp.abs(out_f32 - ref_f32))))

    # ---- bf16 MXU path (production default): check vs bf16-operand reference
    run_bf16 = jax.jit(functools.partial(
        dense_layer_pallas, H=H, W=W, mxu_dtype=jnp.bfloat16))
    out_bf16 = jax.block_until_ready(run_bf16(x, params))
    ref_bf16 = jax.block_until_ready(dense_layer_ref(x, params, jnp.bfloat16))
    assert jnp.allclose(out_bf16, ref_bf16, rtol=2e-2, atol=2e-2), (
        float(jnp.max(jnp.abs(out_bf16 - ref_bf16))))

    print("KERNEL_OK")
</pallas_src>

<mosaic_0001>
module attributes {stable_mosaic.version = 11 : i64} {
  func.func @_dense_layer_kernel(%arg0: i32, %arg1: memref<2x4x256xf32, #tpu.memory_space<vmem>>, %arg2: memref<8x4xf32, #tpu.memory_space<vmem>>, %arg3: memref<8x1xf32, #tpu.memory_space<vmem>>, %arg4: memref<8x256xf32, #tpu.memory_space<vmem>>, %arg5: memref<8x256xf32, #tpu.memory_space<vmem>>, %arg6: memref<4x72xf32, #tpu.memory_space<vmem>>, %arg7: memref<4x1xf32, #tpu.memory_space<vmem>>, %arg8: memref<4x256xf32, #tpu.memory_space<vmem>>, %arg9: memref<4x256xf32, #tpu.memory_space<vmem>>, %arg10: memref<9x1x256xf32, #tpu.memory_space<vmem>>, %arg11: memref<2x4x256xf32, #tpu.memory_space<vmem>>, %arg12: memref<72x256xf32, #tpu.memory_space<vmem>>) attributes {dimension_semantics = [#tpu.dimension_semantics<parallel>], iteration_bounds = array<i64: 2>, scalar_prefetch = 0 : i64, scratch_operands = 1 : i64, tpu.core_type = #tpu.core_type<tc>, window_params = [{transform_indices = @transform_0, window_bounds = array<i64: 2, 4, 256>}, {pipeline_mode = #tpu.pipeline_mode<synchronous>, transform_indices = @transform_1, window_bounds = array<i64: 8, 4>}, {pipeline_mode = #tpu.pipeline_mode<synchronous>, transform_indices = @transform_2, window_bounds = array<i64: 8, 1>}, {pipeline_mode = #tpu.pipeline_mode<synchronous>, transform_indices = @transform_3, window_bounds = array<i64: 8, 256>}, {pipeline_mode = #tpu.pipeline_mode<synchronous>, transform_indices = @transform_4, window_bounds = array<i64: 8, 256>}, {pipeline_mode = #tpu.pipeline_mode<synchronous>, transform_indices = @transform_5, window_bounds = array<i64: 4, 72>}, {pipeline_mode = #tpu.pipeline_mode<synchronous>, transform_indices = @transform_6, window_bounds = array<i64: 4, 1>}, {pipeline_mode = #tpu.pipeline_mode<synchronous>, transform_indices = @transform_7, window_bounds = array<i64: 4, 256>}, {pipeline_mode = #tpu.pipeline_mode<synchronous>, transform_indices = @transform_8, window_bounds = array<i64: 4, 256>}, {pipeline_mode = #tpu.pipeline_mode<synchronous>, transform_indices = @transform_9, window_bounds = array<i64: 9, 1, 256>}, {transform_indices = @transform_10, window_bounds = array<i64: 2, 4, 256>}]} {
    %c0 = arith.constant 0 : index
    %c0_0 = arith.constant 0 : index
    %0 = vector.load %arg2[%c0, %c0_0] : memref<8x4xf32, #tpu.memory_space<vmem>>, vector<8x4xf32>
    %c0_1 = arith.constant 0 : index
    %c0_2 = arith.constant 0 : index
    %1 = vector.load %arg6[%c0_1, %c0_2] : memref<4x72xf32, #tpu.memory_space<vmem>>, vector<4x72xf32>
    %c0_3 = arith.constant 0 : index
    %c0_4 = arith.constant 0 : index
    %2 = vector.load %arg3[%c0_3, %c0_4] : memref<8x1xf32, #tpu.memory_space<vmem>>, vector<8x1xf32>
    %c0_5 = arith.constant 0 : index
    %c0_6 = arith.constant 0 : index
    %3 = vector.load %arg7[%c0_5, %c0_6] : memref<4x1xf32, #tpu.memory_space<vmem>>, vector<4x1xf32>
    %c0_7 = arith.constant 0 : index
    %c0_8 = arith.constant 0 : index
    %4 = vector.load %arg4[%c0_7, %c0_8] : memref<8x256xf32, #tpu.memory_space<vmem>>, vector<8x256xf32>
    %c0_9 = arith.constant 0 : index
    %c0_10 = arith.constant 0 : index
    %5 = vector.load %arg5[%c0_9, %c0_10] : memref<8x256xf32, #tpu.memory_space<vmem>>, vector<8x256xf32>
    %c0_11 = arith.constant 0 : index
    %c0_12 = arith.constant 0 : index
    %6 = vector.load %arg8[%c0_11, %c0_12] : memref<4x256xf32, #tpu.memory_space<vmem>>, vector<4x256xf32>
    %c0_13 = arith.constant 0 : index
    %c0_14 = arith.constant 0 : index
    %7 = vector.load %arg9[%c0_13, %c0_14] : memref<4x256xf32, #tpu.memory_space<vmem>>, vector<4x256xf32>
    %c0_15 = arith.constant 0 : index
    %c0_16 = arith.constant 0 : index
    %c0_17 = arith.constant 0 : index
    %8 = vector.load %arg1[%c0_15, %c0_16, %c0_17] : memref<2x4x256xf32, #tpu.memory_space<vmem>>, vector<1x4x256xf32>
    %9 = vector.shape_cast %8 : vector<1x4x256xf32> to vector<4x256xf32>
    %cst = arith.constant dense<0.000000e+00> : vector<8x256xf32>
    %10 = tpu.matmul %0, %9, %cst {dimension_numbers = #tpu.dot_dimension_numbers<[1], [0], [0], [1], [0, 0, 1, 1], [], []>} : vector<8x4xf32>, vector<4x256xf32>, vector<8x256xf32> -> vector<8x256xf32>
    %11 = vector.broadcast %2 : vector<8x1xf32> to vector<8x256xf32>
    %12 = arith.addf %10, %11 : vector<8x256xf32>
    %13 = vector.shape_cast %12 : vector<8x256xf32> to vector<1x8x256xf32>
    %cst_18 = arith.constant dense<0.000000e+00> : vector<1xf32>
    %14 = vector.multi_reduction <add>, %13, %cst_18 [1, 2] : vector<1x8x256xf32> to vector<1xf32>
    %15 = vector.shape_cast %14 : vector<1xf32> to vector<1x1x1xf32>
    %16 = vector.extract %15[0, 0, 0] : f32 from vector<1x1x1xf32>
    %cst_19 = arith.constant 4.8828125E-4 : f32
    %17 = arith.mulf %16, %cst_19 : f32
    %18 = arith.mulf %12, %12 : vector<8x256xf32>
    %19 = vector.shape_cast %18 : vector<8x256xf32> to vector<1x8x256xf32>
    %cst_20 = arith.constant dense<0.000000e+00> : vector<1xf32>
    %20 = vector.multi_reduction <add>, %19, %cst_20 [1, 2] : vector<1x8x256xf32> to vector<1xf32>
    %21 = vector.shape_cast %20 : vector<1xf32> to vector<1x1x1xf32>
    %22 = vector.extract %21[0, 0, 0] : f32 from vector<1x1x1xf32>
    %cst_21 = arith.constant 4.8828125E-4 : f32
    %23 = arith.mulf %22, %cst_21 : f32
    %24 = arith.mulf %17, %17 : f32
    %25 = arith.subf %23, %24 : f32
    %cst_22 = arith.constant 0.000000e+00 : f32
    %26 = arith.maximumf %25, %cst_22 : f32
    %27 = vector.broadcast %17 : f32 to vector<8x256xf32>
    %28 = arith.subf %12, %27 : vector<8x256xf32>
    %cst_23 = arith.constant 9.99999974E-6 : f32
    %29 = arith.addf %26, %cst_23 : f32
    %30 = math.rsqrt %29 : f32
    %31 = vector.broadcast %30 : f32 to vector<8x256xf32>
    %32 = arith.mulf %28, %31 : vector<8x256xf32>
    %33 = arith.mulf %32, %4 : vector<8x256xf32>
    %34 = arith.addf %33, %5 : vector<8x256xf32>
    %cst_24 = arith.constant 0.000000e+00 : f32
    %35 = vector.broadcast %cst_24 : f32 to vector<8x256xf32>
    %36 = arith.maximumf %34, %35 : vector<8x256xf32>
    %c17_i32 = arith.constant 17 : i32
    %37 = tpu.dynamic_rotate %36 by %c17_i32 dim 1 : vector<8x256xf32>, i32 -> vector<8x256xf32>
    %c0_25 = arith.constant 0 : index
    %c0_26 = arith.constant 0 : index
    %c0_27 = arith.constant 0 : index
    %38 = vector.load %arg10[%c0_25, %c0_26, %c0_27] : memref<9x1x256xf32, #tpu.memory_space<vmem>>, vector<1x1x256xf32>
    %39 = vector.shape_cast %38 : vector<1x1x256xf32> to vector<1x256xf32>
    %40 = vector.broadcast %39 : vector<1x256xf32> to vector<8x256xf32>
    %41 = arith.mulf %37, %40 : vector<8x256xf32>
    %c0_28 = arith.constant 0 : index
    %c0_29 = arith.constant 0 : index
    %42 = vector.load %arg12[%c0_28, %c0_29] : memref<72x256xf32, #tpu.memory_space<vmem>>, vector<8x256xf32>
    tpu.vector_store %arg12[%c0_28, %c0_29], %41 {strides = array<i32>} : memref<72x256xf32, #tpu.memory_space<vmem>>, vector<8x256xf32>,
    %c16_i32 = arith.constant 16 : i32
    %43 = tpu.dynamic_rotate %36 by %c16_i32 dim 1 : vector<8x256xf32>, i32 -> vector<8x256xf32>
    %c1 = arith.constant 1 : index
    %c0_30 = arith.constant 0 : index
    %c0_31 = arith.constant 0 : index
    %44 = vector.load %arg10[%c1, %c0_30, %c0_31] : memref<9x1x256xf32, #tpu.memory_space<vmem>>, vector<1x1x256xf32>
    %45 = vector.shape_cast %44 : vector<1x1x256xf32> to vector<1x256xf32>
    %46 = vector.broadcast %45 : vector<1x256xf32> to vector<8x256xf32>
    %47 = arith.mulf %43, %46 : vector<8x256xf32>
    %c8 = arith.constant 8 : index
    %c0_32 = arith.constant 0 : index
    %48 = vector.load %arg12[%c8, %c0_32] : memref<72x256xf32, #tpu.memory_space<vmem>>, vector<8x256xf32>
    tpu.vector_store %arg12[%c8, %c0_32], %47 {strides = array<i32>} : memref<72x256xf32, #tpu.memory_space<vmem>>, vector<8x256xf32>,
    %c15_i32 = arith.constant 15 : i32
    %49 = tpu.dynamic_rotate %36 by %c15_i32 dim 1 : vector<8x256xf32>, i32 -> vector<8x256xf32>
    %c2 = arith.constant 2 : index
    %c0_33 = arith.constant 0 : index
    %c0_34 = arith.constant 0 : index
    %50 = vector.load %arg10[%c2, %c0_33, %c0_34] : memref<9x1x256xf32, #tpu.memory_space<vmem>>, vector<1x1x256xf32>
    %51 = vector.shape_cast %50 : vector<1x1x256xf32> to vector<1x256xf32>
    %52 = vector.broadcast %51 : vector<1x256xf32> to vector<8x256xf32>
    %53 = arith.mulf %49, %52 : vector<8x256xf32>
    %c16 = arith.constant 16 : index
    %c0_35 = arith.constant 0 : index
    %54 = vector.load %arg12[%c16, %c0_35] : memref<72x256xf32, #tpu.memory_space<vmem>>, vector<8x256xf32>
    tpu.vector_store %arg12[%c16, %c0_35], %53 {strides = array<i32>} : memref<72x256xf32, #tpu.memory_space<vmem>>, vector<8x256xf32>,
    %c1_i32 = arith.constant 1 : i32
    %55 = tpu.dynamic_rotate %36 by %c1_i32 dim 1 : vector<8x256xf32>, i32 -> vector<8x256xf32>
    %c3 = arith.constant 3 : index
    %c0_36 = arith.constant 0 : index
    %c0_37 = arith.constant 0 : index
    %56 = vector.load %arg10[%c3, %c0_36, %c0_37] : memref<9x1x256xf32, #tpu.memory_space<vmem>>, vector<1x1x256xf32>
    %57 = vector.shape_cast %56 : vector<1x1x256xf32> to vector<1x256xf32>
    %58 = vector.broadcast %57 : vector<1x256xf32> to vector<8x256xf32>
    %59 = arith.mulf %55, %58 : vector<8x256xf32>
    %c24 = arith.constant 24 : index
    %c0_38 = arith.constant 0 : index
    %60 = vector.load %arg12[%c24, %c0_38] : memref<72x256xf32, #tpu.memory_space<vmem>>, vector<8x256xf32>
    tpu.vector_store %arg12[%c24, %c0_38], %59 {strides = array<i32>} : memref<72x256xf32, #tpu.memory_space<vmem>>, vector<8x256xf32>,
    %c32 = arith.constant 32 : index
    %c0_39 = arith.constant 0 : index
    %61 = vector.load %arg12[%c32, %c0_39] : memref<72x256xf32, #tpu.memory_space<vmem>>, vector<8x256xf32>
    tpu.vector_store %arg12[%c32, %c0_39], %36 {strides = array<i32>} : memref<72x256xf32, #tpu.memory_space<vmem>>, vector<8x256xf32>,
    %c255_i32 = arith.constant 255 : i32
    %62 = tpu.dynamic_rotate %36 by %c255_i32 dim 1 : vector<8x256xf32>, i32 -> vector<8x256xf32>
    %c5 = arith.constant 5 : index
    %c0_40 = arith.constant 0 : index
    %c0_41 = arith.constant 0 : index
    %63 = vector.load %arg10[%c5, %c0_40, %c0_41] : memref<9x1x256xf32, #tpu.memory_space<vmem>>, vector<1x1x256xf32>
    %64 = vector.shape_cast %63 : vector<1x1x256xf32> to vector<1x256xf32>
    %65 = vector.broadcast %64 : vector<1x256xf32> to vector<8x256xf32>
    %66 = arith.mulf %62, %65 : vector<8x256xf32>
    %c40 = arith.constant 40 : index
    %c0_42 = arith.constant 0 : index
    %67 = vector.load %arg12[%c40, %c0_42] : memref<72x256xf32, #tpu.memory_space<vmem>>, vector<8x256xf32>
    tpu.vector_store %arg12[%c40, %c0_42], %66 {strides = array<i32>} : memref<72x256xf32, #tpu.memory_space<vmem>>, vector<8x256xf32>,
    %c241_i32 = arith.constant 241 : i32
    %68 = tpu.dynamic_rotate %36 by %c241_i32 dim 1 : vector<8x256xf32>, i32 -> vector<8x256xf32>
    %c6 = arith.constant 6 : index
    %c0_43 = arith.constant 0 : index
    %c0_44 = arith.constant 0 : index
    %69 = vector.load %arg10[%c6, %c0_43, %c0_44] : memref<9x1x256xf32, #tpu.memory_space<vmem>>, vector<1x1x256xf32>
    %70 = vector.shape_cast %69 : vector<1x1x256xf32> to vector<1x256xf32>
    %71 = vector.broadcast %70 : vector<1x256xf32> to vector<8x256xf32>
    %72 = arith.mulf %68, %71 : vector<8x256xf32>
    %c48 = arith.constant 48 : index
    %c0_45 = arith.constant 0 : index
    %73 = vector.load %arg12[%c48, %c0_45] : memref<72x256xf32, #tpu.memory_space<vmem>>, vector<8x256xf32>
    tpu.vector_store %arg12[%c48, %c0_45], %72 {strides = array<i32>} : memref<72x256xf32, #tpu.memory_space<vmem>>, vector<8x256xf32>,
    %c240_i32 = arith.constant 240 : i32
    %74 = tpu.dynamic_rotate %36 by %c240_i32 dim 1 : vector<8x256xf32>, i32 -> vector<8x256xf32>
    %c7 = arith.constant 7 : index
    %c0_46 = arith.constant 0 : index
    %c0_47 = arith.constant 0 : index
    %75 = vector.load %arg10[%c7, %c0_46, %c0_47] : memref<9x1x256xf32, #tpu.memory_space<vmem>>, vector<1x1x256xf32>
    %76 = vector.shape_cast %75 : vector<1x1x256xf32> to vector<1x256xf32>
    %77 = vector.broadcast %76 : vector<1x256xf32> to vector<8x256xf32>
    %78 = arith.mulf %74, %77 : vector<8x256xf32>
    %c56 = arith.constant 56 : index
    %c0_48 = arith.constant 0 : index
    %79 = vector.load %arg12[%c56, %c0_48] : memref<72x256xf32, #tpu.memory_space<vmem>>, vector<8x256xf32>
    tpu.vector_store %arg12[%c56, %c0_48], %78 {strides = array<i32>} : memref<72x256xf32, #tpu.memory_space<vmem>>, vector<8x256xf32>,
    %c239_i32 = arith.constant 239 : i32
    %80 = tpu.dynamic_rotate %36 by %c239_i32 dim 1 : vector<8x256xf32>, i32 -> vector<8x256xf32>
    %c8_49 = arith.constant 8 : index
    %c0_50 = arith.constant 0 : index
    %c0_51 = arith.constant 0 : index
    %81 = vector.load %arg10[%c8_49, %c0_50, %c0_51] : memref<9x1x256xf32, #tpu.memory_space<vmem>>, vector<1x1x256xf32>
    %82 = vector.shape_cast %81 : vector<1x1x256xf32> to vector<1x256xf32>
    %83 = vector.broadcast %82 : vector<1x256xf32> to vector<8x256xf32>
    %84 = arith.mulf %80, %83 : vector<8x256xf32>
    %c64 = arith.constant 64 : index
    %c0_52 = arith.constant 0 : index
    %85 = vector.load %arg12[%c64, %c0_52] : memref<72x256xf32, #tpu.memory_space<vmem>>, vector<8x256xf32>
    tpu.vector_store %arg12[%c64, %c0_52], %84 {strides = array<i32>} : memref<72x256xf32, #tpu.memory_space<vmem>>, vector<8x256xf32>,
    %c0_53 = arith.constant 0 : index
    %c0_54 = arith.constant 0 : index
    %86 = vector.load %arg12[%c0_53, %c0_54] : memref<72x256xf32, #tpu.memory_space<vmem>>, vector<72x256xf32>
    %cst_55 = arith.constant dense<0.000000e+00> : vector<4x256xf32>
    %87 = tpu.matmul %1, %86, %cst_55 {dimension_numbers = #tpu.dot_dimension_numbers<[1], [0], [0], [1], [0, 0, 1, 1], [], []>} : vector<4x72xf32>, vector<72x256xf32>, vector<4x256xf32> -> vector<4x256xf32>
    %88 = vector.broadcast %3 : vector<4x1xf32> to vector<4x256xf32>
    %89 = arith.addf %87, %88 : vector<4x256xf32>
    %90 = vector.shape_cast %89 : vector<4x256xf32> to vector<1x4x256xf32>
    %cst_56 = arith.constant dense<0.000000e+00> : vector<1xf32>
    %91 = vector.multi_reduction <add>, %90, %cst_56 [1, 2] : vector<1x4x256xf32> to vector<1xf32>
    %92 = vector.shape_cast %91 : vector<1xf32> to vector<1x1x1xf32>
    %93 = vector.extract %92[0, 0, 0] : f32 from vector<1x1x1xf32>
    %cst_57 = arith.constant 9.765625E-4 : f32
    %94 = arith.mulf %93, %cst_57 : f32
    %95 = arith.mulf %89, %89 : vector<4x256xf32>
    %96 = vector.shape_cast %95 : vector<4x256xf32> to vector<1x4x256xf32>
    %cst_58 = arith.constant dense<0.000000e+00> : vector<1xf32>
    %97 = vector.multi_reduction <add>, %96, %cst_58 [1, 2] : vector<1x4x256xf32> to vector<1xf32>
    %98 = vector.shape_cast %97 : vector<1xf32> to vector<1x1x1xf32>
    %99 = vector.extract %98[0, 0, 0] : f32 from vector<1x1x1xf32>
    %cst_59 = arith.constant 9.765625E-4 : f32
    %100 = arith.mulf %99, %cst_59 : f32
    %101 = arith.mulf %94, %94 : f32
    %102 = arith.subf %100, %101 : f32
    %cst_60 = arith.constant 0.000000e+00 : f32
    %103 = arith.maximumf %102, %cst_60 : f32
    %104 = vector.broadcast %94 : f32 to vector<4x256xf32>
    %105 = arith.subf %89, %104 : vector<4x256xf32>
    %cst_61 = arith.constant 9.99999974E-6 : f32
    %106 = arith.addf %103, %cst_61 : f32
    %107 = math.rsqrt %106 : f32
    %108 = vector.broadcast %107 : f32 to vector<4x256xf32>
    %109 = arith.mulf %105, %108 : vector<4x256xf32>
    %110 = arith.mulf %109, %6 : vector<4x256xf32>
    %111 = arith.addf %110, %7 : vector<4x256xf32>
    %cst_62 = arith.constant 0.000000e+00 : f32
    %112 = vector.broadcast %cst_62 : f32 to vector<4x256xf32>
    %113 = arith.maximumf %111, %112 : vector<4x256xf32>
    %c0_63 = arith.constant 0 : index
    %c0_64 = arith.constant 0 : index
    %c0_65 = arith.constant 0 : index
    %114 = vector.load %arg11[%c0_63, %c0_64, %c0_65] : memref<2x4x256xf32, #tpu.memory_space<vmem>>, vector<1x4x256xf32>
    %115 = vector.shape_cast %114 : vector<1x4x256xf32> to vector<4x256xf32>
    %116 = vector.shape_cast %113 : vector<4x256xf32> to vector<1x4x256xf32>
    tpu.vector_store %arg11[%c0_63, %c0_64, %c0_65], %116 {strides = array<i32>} : memref<2x4x256xf32, #tpu.memory_space<vmem>>, vector<1x4x256xf32>,
    %c1_66 = arith.constant 1 : index
    %c0_67 = arith.constant 0 : index
    %c0_68 = arith.constant 0 : index
    %117 = vector.load %arg1[%c1_66, %c0_67, %c0_68] : memref<2x4x256xf32, #tpu.memory_space<vmem>>, vector<1x4x256xf32>
    %118 = vector.shape_cast %117 : vector<1x4x256xf32> to vector<4x256xf32>
    %cst_69 = arith.constant dense<0.000000e+00> : vector<8x256xf32>
    %119 = tpu.matmul %0, %118, %cst_69 {dimension_numbers = #tpu.dot_dimension_numbers<[1], [0], [0], [1], [0, 0, 1, 1], [], []>} : vector<8x4xf32>, vector<4x256xf32>, vector<8x256xf32> -> vector<8x256xf32>
    %120 = vector.broadcast %2 : vector<8x1xf32> to vector<8x256xf32>
    %121 = arith.addf %119, %120 : vector<8x256xf32>
    %122 = vector.shape_cast %121 : vector<8x256xf32> to vector<1x8x256xf32>
    %cst_70 = arith.constant dense<0.000000e+00> : vector<1xf32>
    %123 = vector.multi_reduction <add>, %122, %cst_70 [1, 2] : vector<1x8x256xf32> to vector<1xf32>
    %124 = vector.shape_cast %123 : vector<1xf32> to vector<1x1x1xf32>
    %125 = vector.extract %124[0, 0, 0] : f32 from vector<1x1x1xf32>
    %cst_71 = arith.constant 4.8828125E-4 : f32
    %126 = arith.mulf %125, %cst_71 : f32
    %127 = arith.mulf %121, %121 : vector<8x256xf32>
    %128 = vector.shape_cast %127 : vector<8x256xf32> to vector<1x8x256xf32>
    %cst_72 = arith.constant dense<0.000000e+00> : vector<1xf32>
    %129 = vector.multi_reduction <add>, %128, %cst_72 [1, 2] : vector<1x8x256xf32> to vector<1xf32>
    %130 = vector.shape_cast %129 : vector<1xf32> to vector<1x1x1xf32>
    %131 = vector.extract %130[0, 0, 0] : f32 from vector<1x1x1xf32>
    %cst_73 = arith.constant 4.8828125E-4 : f32
    %132 = arith.mulf %131, %cst_73 : f32
    %133 = arith.mulf %126, %126 : f32
    %134 = arith.subf %132, %133 : f32
    %cst_74 = arith.constant 0.000000e+00 : f32
    %135 = arith.maximumf %134, %cst_74 : f32
    %136 = vector.broadcast %126 : f32 to vector<8x256xf32>
    %137 = arith.subf %121, %136 : vector<8x256xf32>
    %cst_75 = arith.constant 9.99999974E-6 : f32
    %138 = arith.addf %135, %cst_75 : f32
    %139 = math.rsqrt %138 : f32
    %140 = vector.broadcast %139 : f32 to vector<8x256xf32>
    %141 = arith.mulf %137, %140 : vector<8x256xf32>
    %142 = arith.mulf %141, %4 : vector<8x256xf32>
    %143 = arith.addf %142, %5 : vector<8x256xf32>
    %cst_76 = arith.constant 0.000000e+00 : f32
    %144 = vector.broadcast %cst_76 : f32 to vector<8x256xf32>
    %145 = arith.maximumf %143, %144 : vector<8x256xf32>
    %c17_i32_77 = arith.constant 17 : i32
    %146 = tpu.dynamic_rotate %145 by %c17_i32_77 dim 1 : vector<8x256xf32>, i32 -> vector<8x256xf32>
    %c0_78 = arith.constant 0 : index
    %c0_79 = arith.constant 0 : index
    %c0_80 = arith.constant 0 : index
    %147 = vector.load %arg10[%c0_78, %c0_79, %c0_80] : memref<9x1x256xf32, #tpu.memory_space<vmem>>, vector<1x1x256xf32>
    %148 = vector.shape_cast %147 : vector<1x1x256xf32> to vector<1x256xf32>
    %149 = vector.broadcast %148 : vector<1x256xf32> to vector<8x256xf32>
    %150 = arith.mulf %146, %149 : vector<8x256xf32>
    %c0_81 = arith.constant 0 : index
    %c0_82 = arith.constant 0 : index
    %151 = vector.load %arg12[%c0_81, %c0_82] : memref<72x256xf32, #tpu.memory_space<vmem>>, vector<8x256xf32>
    tpu.vector_store %arg12[%c0_81, %c0_82], %150 {strides = array<i32>} : memref<72x256xf32, #tpu.memory_space<vmem>>, vector<8x256xf32>,
    %c16_i32_83 = arith.constant 16 : i32
    %152 = tpu.dynamic_rotate %145 by %c16_i32_83 dim 1 : vector<8x256xf32>, i32 -> vector<8x256xf32>
    %c1_84 = arith.constant 1 : index
    %c0_85 = arith.constant 0 : index
    %c0_86 = arith.constant 0 : index
    %153 = vector.load %arg10[%c1_84, %c0_85, %c0_86] : memref<9x1x256xf32, #tpu.memory_space<vmem>>, vector<1x1x256xf32>
    %154 = vector.shape_cast %153 : vector<1x1x256xf32> to vector<1x256xf32>
    %155 = vector.broadcast %154 : vector<1x256xf32> to vector<8x256xf32>
    %156 = arith.mulf %152, %155 : vector<8x256xf32>
    %c8_87 = arith.constant 8 : index
    %c0_88 = arith.constant 0 : index
    %157 = vector.load %arg12[%c8_87, %c0_88] : memref<72x256xf32, #tpu.memory_space<vmem>>, vector<8x256xf32>
    tpu.vector_store %arg12[%c8_87, %c0_88], %156 {strides = array<i32>} : memref<72x256xf32, #tpu.memory_space<vmem>>, vector<8x256xf32>,
    %c15_i32_89 = arith.constant 15 : i32
    %158 = tpu.dynamic_rotate %145 by %c15_i32_89 dim 1 : vector<8x256xf32>, i32 -> vector<8x256xf32>
    %c2_90 = arith.constant 2 : index
    %c0_91 = arith.constant 0 : index
    %c0_92 = arith.constant 0 : index
    %159 = vector.load %arg10[%c2_90, %c0_91, %c0_92] : memref<9x1x256xf32, #tpu.memory_space<vmem>>, vector<1x1x256xf32>
    %160 = vector.shape_cast %159 : vector<1x1x256xf32> to vector<1x256xf32>
    %161 = vector.broadcast %160 : vector<1x256xf32> to vector<8x256xf32>
    %162 = arith.mulf %158, %161 : vector<8x256xf32>
    %c16_93 = arith.constant 16 : index
    %c0_94 = arith.constant 0 : index
    %163 = vector.load %arg12[%c16_93, %c0_94] : memref<72x256xf32, #tpu.memory_space<vmem>>, vector<8x256xf32>
    tpu.vector_store %arg12[%c16_93, %c0_94], %162 {strides = array<i32>} : memref<72x256xf32, #tpu.memory_space<vmem>>, vector<8x256xf32>,
    %c1_i32_95 = arith.constant 1 : i32
    %164 = tpu.dynamic_rotate %145 by %c1_i32_95 dim 1 : vector<8x256xf32>, i32 -> vector<8x256xf32>
    %c3_96 = arith.constant 3 : index
    %c0_97 = arith.constant 0 : index
    %c0_98 = arith.constant 0 : index
    %165 = vector.load %arg10[%c3_96, %c0_97, %c0_98] : memref<9x1x256xf32, #tpu.memory_space<vmem>>, vector<1x1x256xf32>
    %166 = vector.shape_cast %165 : vector<1x1x256xf32> to vector<1x256xf32>
    %167 = vector.broadcast %166 : vector<1x256xf32> to vector<8x256xf32>
    %168 = arith.mulf %164, %167 : vector<8x256xf32>
    %c24_99 = arith.constant 24 : index
    %c0_100 = arith.constant 0 : index
    %169 = vector.load %arg12[%c24_99, %c0_100] : memref<72x256xf32, #tpu.memory_space<vmem>>, vector<8x256xf32>
    tpu.vector_store %arg12[%c24_99, %c0_100], %168 {strides = array<i32>} : memref<72x256xf32, #tpu.memory_space<vmem>>, vector<8x256xf32>,
    %c32_101 = arith.constant 32 : index
    %c0_102 = arith.constant 0 : index
    %170 = vector.load %arg12[%c32_101, %c0_102] : memref<72x256xf32, #tpu.memory_space<vmem>>, vector<8x256xf32>
    tpu.vector_store %arg12[%c32_101, %c0_102], %145 {strides = array<i32>} : memref<72x256xf32, #tpu.memory_space<vmem>>, vector<8x256xf32>,
    %c255_i32_103 = arith.constant 255 : i32
    %171 = tpu.dynamic_rotate %145 by %c255_i32_103 dim 1 : vector<8x256xf32>, i32 -> vector<8x256xf32>
    %c5_104 = arith.constant 5 : index
    %c0_105 = arith.constant 0 : index
    %c0_106 = arith.constant 0 : index
    %172 = vector.load %arg10[%c5_104, %c0_105, %c0_106] : memref<9x1x256xf32, #tpu.memory_space<vmem>>, vector<1x1x256xf32>
    %173 = vector.shape_cast %172 : vector<1x1x256xf32> to vector<1x256xf32>
    %174 = vector.broadcast %173 : vector<1x256xf32> to vector<8x256xf32>
    %175 = arith.mulf %171, %174 : vector<8x256xf32>
    %c40_107 = arith.constant 40 : index
    %c0_108 = arith.constant 0 : index
    %176 = vector.load %arg12[%c40_107, %c0_108] : memref<72x256xf32, #tpu.memory_space<vmem>>, vector<8x256xf32>
    tpu.vector_store %arg12[%c40_107, %c0_108], %175 {strides = array<i32>} : memref<72x256xf32, #tpu.memory_space<vmem>>, vector<8x256xf32>,
    %c241_i32_109 = arith.constant 241 : i32
    %177 = tpu.dynamic_rotate %145 by %c241_i32_109 dim 1 : vector<8x256xf32>, i32 -> vector<8x256xf32>
    %c6_110 = arith.constant 6 : index
    %c0_111 = arith.constant 0 : index
    %c0_112 = arith.constant 0 : index
    %178 = vector.load %arg10[%c6_110, %c0_111, %c0_112] : memref<9x1x256xf32, #tpu.memory_space<vmem>>, vector<1x1x256xf32>
    %179 = vector.shape_cast %178 : vector<1x1x256xf32> to vector<1x256xf32>
    %180 = vector.broadcast %179 : vector<1x256xf32> to vector<8x256xf32>
    %181 = arith.mulf %177, %180 : vector<8x256xf32>
    %c48_113 = arith.constant 48 : index
    %c0_114 = arith.constant 0 : index
    %182 = vector.load %arg12[%c48_113, %c0_114] : memref<72x256xf32, #tpu.memory_space<vmem>>, vector<8x256xf32>
    tpu.vector_store %arg12[%c48_113, %c0_114], %181 {strides = array<i32>} : memref<72x256xf32, #tpu.memory_space<vmem>>, vector<8x256xf32>,
    %c240_i32_115 = arith.constant 240 : i32
    %183 = tpu.dynamic_rotate %145 by %c240_i32_115 dim 1 : vector<8x256xf32>, i32 -> vector<8x256xf32>
    %c7_116 = arith.constant 7 : index
    %c0_117 = arith.constant 0 : index
    %c0_118 = arith.constant 0 : index
    %184 = vector.load %arg10[%c7_116, %c0_117, %c0_118] : memref<9x1x256xf32, #tpu.memory_space<vmem>>, vector<1x1x256xf32>
    %185 = vector.shape_cast %184 : vector<1x1x256xf32> to vector<1x256xf32>
    %186 = vector.broadcast %185 : vector<1x256xf32> to vector<8x256xf32>
    %187 = arith.mulf %183, %186 : vector<8x256xf32>
    %c56_119 = arith.constant 56 : index
    %c0_120 = arith.constant 0 : index
    %188 = vector.load %arg12[%c56_119, %c0_120] : memref<72x256xf32, #tpu.memory_space<vmem>>, vector<8x256xf32>
    tpu.vector_store %arg12[%c56_119, %c0_120], %187 {strides = array<i32>} : memref<72x256xf32, #tpu.memory_space<vmem>>, vector<8x256xf32>,
    %c239_i32_121 = arith.constant 239 : i32
    %189 = tpu.dynamic_rotate %145 by %c239_i32_121 dim 1 : vector<8x256xf32>, i32 -> vector<8x256xf32>
    %c8_122 = arith.constant 8 : index
    %c0_123 = arith.constant 0 : index
    %c0_124 = arith.constant 0 : index
    %190 = vector.load %arg10[%c8_122, %c0_123, %c0_124] : memref<9x1x256xf32, #tpu.memory_space<vmem>>, vector<1x1x256xf32>
    %191 = vector.shape_cast %190 : vector<1x1x256xf32> to vector<1x256xf32>
    %192 = vector.broadcast %191 : vector<1x256xf32> to vector<8x256xf32>
    %193 = arith.mulf %189, %192 : vector<8x256xf32>
    %c64_125 = arith.constant 64 : index
    %c0_126 = arith.constant 0 : index
    %194 = vector.load %arg12[%c64_125, %c0_126] : memref<72x256xf32, #tpu.memory_space<vmem>>, vector<8x256xf32>
    tpu.vector_store %arg12[%c64_125, %c0_126], %193 {strides = array<i32>} : memref<72x256xf32, #tpu.memory_space<vmem>>, vector<8x256xf32>,
    %c0_127 = arith.constant 0 : index
    %c0_128 = arith.constant 0 : index
    %195 = vector.load %arg12[%c0_127, %c0_128] : memref<72x256xf32, #tpu.memory_space<vmem>>, vector<72x256xf32>
    %cst_129 = arith.constant dense<0.000000e+00> : vector<4x256xf32>
    %196 = tpu.matmul %1, %195, %cst_129 {dimension_numbers = #tpu.dot_dimension_numbers<[1], [0], [0], [1], [0, 0, 1, 1], [], []>} : vector<4x72xf32>, vector<72x256xf32>, vector<4x256xf32> -> vector<4x256xf32>
    %197 = vector.broadcast %3 : vector<4x1xf32> to vector<4x256xf32>
    %198 = arith.addf %196, %197 : vector<4x256xf32>
    %199 = vector.shape_cast %198 : vector<4x256xf32> to vector<1x4x256xf32>
    %cst_130 = arith.constant dense<0.000000e+00> : vector<1xf32>
    %200 = vector.multi_reduction <add>, %199, %cst_130 [1, 2] : vector<1x4x256xf32> to vector<1xf32>
    %201 = vector.shape_cast %200 : vector<1xf32> to vector<1x1x1xf32>
    %202 = vector.extract %201[0, 0, 0] : f32 from vector<1x1x1xf32>
    %cst_131 = arith.constant 9.765625E-4 : f32
    %203 = arith.mulf %202, %cst_131 : f32
    %204 = arith.mulf %198, %198 : vector<4x256xf32>
    %205 = vector.shape_cast %204 : vector<4x256xf32> to vector<1x4x256xf32>
    %cst_132 = arith.constant dense<0.000000e+00> : vector<1xf32>
    %206 = vector.multi_reduction <add>, %205, %cst_132 [1, 2] : vector<1x4x256xf32> to vector<1xf32>
    %207 = vector.shape_cast %206 : vector<1xf32> to vector<1x1x1xf32>
    %208 = vector.extract %207[0, 0, 0] : f32 from vector<1x1x1xf32>
    %cst_133 = arith.constant 9.765625E-4 : f32
    %209 = arith.mulf %208, %cst_133 : f32
    %210 = arith.mulf %203, %203 : f32
    %211 = arith.subf %209, %210 : f32
    %cst_134 = arith.constant 0.000000e+00 : f32
    %212 = arith.maximumf %211, %cst_134 : f32
    %213 = vector.broadcast %203 : f32 to vector<4x256xf32>
    %214 = arith.subf %198, %213 : vector<4x256xf32>
    %cst_135 = arith.constant 9.99999974E-6 : f32
    %215 = arith.addf %212, %cst_135 : f32
    %216 = math.rsqrt %215 : f32
    %217 = vector.broadcast %216 : f32 to vector<4x256xf32>
    %218 = arith.mulf %214, %217 : vector<4x256xf32>
    %219 = arith.mulf %218, %6 : vector<4x256xf32>
    %220 = arith.addf %219, %7 : vector<4x256xf32>
    %cst_136 = arith.constant 0.000000e+00 : f32
    %221 = vector.broadcast %cst_136 : f32 to vector<4x256xf32>
    %222 = arith.maximumf %220, %221 : vector<4x256xf32>
    %c1_137 = arith.constant 1 : index
    %c0_138 = arith.constant 0 : index
    %c0_139 = arith.constant 0 : index
    %223 = vector.load %arg11[%c1_137, %c0_138, %c0_139] : memref<2x4x256xf32, #tpu.memory_space<vmem>>, vector<1x4x256xf32>
    %224 = vector.shape_cast %223 : vector<1x4x256xf32> to vector<4x256xf32>
    %225 = vector.shape_cast %222 : vector<4x256xf32> to vector<1x4x256xf32>
    tpu.vector_store %arg11[%c1_137, %c0_138, %c0_139], %225 {strides = array<i32>} : memref<2x4x256xf32, #tpu.memory_space<vmem>>, vector<1x4x256xf32>,
    return
  }
  func.func @transform_0(%arg0: i32) -> (i32, i32, i32) {
    %c0_i32 = arith.constant 0 : i32
    %c0_i32_0 = arith.constant 0 : i32
    %c0_i32_1 = arith.constant 0 : i32
    return %arg0, %c0_i32, %c0_i32_0 : i32, i32, i32
  }
  func.func @transform_1(%arg0: i32) -> (i32, i32) {
    %c0_i32 = arith.constant 0 : i32
    %c0_i32_0 = arith.constant 0 : i32
    %c0_i32_1 = arith.constant 0 : i32
    return %c0_i32, %c0_i32_0 : i32, i32
  }
  func.func @transform_2(%arg0: i32) -> (i32, i32) {
    %c0_i32 = arith.constant 0 : i32
    %c0_i32_0 = arith.constant 0 : i32
    %c0_i32_1 = arith.constant 0 : i32
    return %c0_i32, %c0_i32_0 : i32, i32
  }
  func.func @transform_3(%arg0: i32) -> (i32, i32) {
    %c0_i32 = arith.constant 0 : i32
    %c0_i32_0 = arith.constant 0 : i32
    %c0_i32_1 = arith.constant 0 : i32
    return %c0_i32, %c0_i32_0 : i32, i32
  }
  func.func @transform_4(%arg0: i32) -> (i32, i32) {
    %c0_i32 = arith.constant 0 : i32
    %c0_i32_0 = arith.constant 0 : i32
    %c0_i32_1 = arith.constant 0 : i32
    return %c0_i32, %c0_i32_0 : i32, i32
  }
  func.func @transform_5(%arg0: i32) -> (i32, i32) {
    %c0_i32 = arith.constant 0 : i32
    %c0_i32_0 = arith.constant 0 : i32
    %c0_i32_1 = arith.constant 0 : i32
    return %c0_i32, %c0_i32_0 : i32, i32
  }
  func.func @transform_6(%arg0: i32) -> (i32, i32) {
    %c0_i32 = arith.constant 0 : i32
    %c0_i32_0 = arith.constant 0 : i32
    %c0_i32_1 = arith.constant 0 : i32
    return %c0_i32, %c0_i32_0 : i32, i32
  }
  func.func @transform_7(%arg0: i32) -> (i32, i32) {
    %c0_i32 = arith.constant 0 : i32
    %c0_i32_0 = arith.constant 0 : i32
    %c0_i32_1 = arith.constant 0 : i32
    return %c0_i32, %c0_i32_0 : i32, i32
  }
  func.func @transform_8(%arg0: i32) -> (i32, i32) {
    %c0_i32 = arith.constant 0 : i32
    %c0_i32_0 = arith.constant 0 : i32
    %c0_i32_1 = arith.constant 0 : i32
    return %c0_i32, %c0_i32_0 : i32, i32
  }
  func.func @transform_9(%arg0: i32) -> (i32, i32, i32) {
    %c0_i32 = arith.constant 0 : i32
    %c0_i32_0 = arith.constant 0 : i32
    %c0_i32_1 = arith.constant 0 : i32
    %c0_i32_2 = arith.constant 0 : i32
    return %c0_i32, %c0_i32_0, %c0_i32_1 : i32, i32, i32
  }
  func.func @transform_10(%arg0: i32) -> (i32, i32, i32) {
    %c0_i32 = arith.constant 0 : i32
    %c0_i32_0 = arith.constant 0 : i32
    %c0_i32_1 = arith.constant 0 : i32
    return %arg0, %c0_i32, %c0_i32_0 : i32, i32, i32
  }
}

</mosaic_0001>

<bundles_post_ra>
// kernel: dense_layer_pallas.1
= control target key start
LH: loop header
LB: loop body
LE: loop exit
PB: predicated region body
PF: predicated region fallthrough
CT: control target
= control target key end

     0   :  { %s1562_s13 = smov 0   ;;  %s1954_s0 = inlined_call_operand.vmem [shape: f32[4,4,256], index: 0, kind: input, shape index: {}]   ;;  %s1955_s1 = inlined_call_operand.vmem [shape: f32[8,4], index: 1, kind: input, shape index: {}]   ;;  %s1956_s2 = inlined_call_operand.vmem [shape: f32[8,1], index: 2, kind: input, shape index: {}]   ;;  %s1957_s3 = inlined_call_operand.vmem [shape: f32[8,256], index: 3, kind: input, shape index: {}]   ;;  %s1958_s4 = inlined_call_operand.vmem [shape: f32[8,256], index: 4, kind: input, shape index: {}]   ;;  %s1959_s5 = inlined_call_operand.vmem [shape: f32[4,72], index: 5, kind: input, shape index: {}]   ;;  %s1960_s6 = inlined_call_operand.vmem [shape: f32[4,1], index: 6, kind: input, shape index: {}]   ;;  %s1961_s7 = inlined_call_operand.vmem [shape: f32[4,256], index: 7, kind: input, shape index: {}]   ;;  %s1962_s8 = inlined_call_operand.vmem [shape: f32[4,256], index: 8, kind: input, shape index: {}]   ;;  %s1963_s9 = inlined_call_operand.vmem [shape: f32[9,1,256], index: 9, kind: input, shape index: {}]   ;;  %s1964_s10 = inlined_call_operand.vmem [shape: f32[4,4,256], index: 10, kind: output, shape index: {}]  }
   0x1 LB: > { %s1360_s14 = sadd.s32 4294967295, %s1494_s13   ;;  %p1364_p0 = scmp.ge.s32.totalorder %s1494_s13, 1  ;;  %s1494_s13 = sphi %s1562_s13, %s20_s13  }
   0x2   : > { %p314_p1 = scmp.lt.s32.totalorder %s1494_s13, 3 }
   0x4   : > { %p315_p2 = pnand %p1364_p0, %p314_p1 }
   0x5   : > { %s1365_s15 = sshll.u32 (!%p315_p2), %s1360_s14, 1  ;;  %v1496_v0 = vmov (!%p315_p2), 0.0   ;;  %v370_v1 = vld [vmem:[%s1956_s2] sm:$0xff] (!%p315_p2)  ;;  %v1497_v2 = vmov (!%p315_p2), 0   ;;  %vm390_vm0 = vcmask (!%p315_p2), 1043456   ;;  %vm386_vm1 = vcmask (!%p315_p2), 31744  }
   0x6   : > { %318 = sbr.rel (%p315_p2) target bundleno = 1924 (0x784), region = 60  ;;  %p355_p3 = scmp.lt.s32.totalorder (!%p315_p2), %s1365_s15, 3  ;;  %459 = vmatprep.mubr.f32.mxu1 (!%p315_p2), %v1496_v0  ;;  %932 = vmatprep.mubr.f32.mxu0 (!%p315_p2), %v1496_v0  ;;  %v368_v7 = vld [vmem:[%s1955_s1] sm:$0xff] (!%p315_p2)  ;;  %v1605_v39 = vld [vmem:[%s1957_s3 + $0x8] sm:$0xff] (!%p315_p2)  ;;  %v513_v52 = vlaneseq (!%p315_p2)  ;;  %vm727_vm10 = vcmask (!%p315_p2), 588800  }
   0x7   : > { %1474 = vset.pattern.permute.xlu0 (!%p315_p2), %v1497_v2  ;;  %1475 = vset.pattern.permute.xlu1 (!%p315_p2), %v1497_v2  ;;  %s1498_s30 = smov (!%p315_p2), 0.0   ;;  %v1600_v38 = vld [vmem:[%s1957_s3] sm:$0xff] (!%p315_p2)  ;;  %v1615_v44 = vld [vmem:[%s1958_s4 + $0x8] sm:$0xff] (!%p315_p2) }
   0x8   : > { %381 = vperm.xlu0 (!%p315_p2), %1474, %v370_v1   ;;  %v1610_v43 = vld [vmem:[%s1958_s4] sm:$0xff] (!%p315_p2)  ;;  %v521_v54 = vshrl.u32 (!%p315_p2), %v513_v52, 7  ;;  %v1660_v55 = vand.u32 (!%p315_p2), 127, %v513_v52  ;;  %v1378_v52 = vld [vmem:[%s1963_s9 + $0xc] sm:$0x3] (!%p315_p2) }
   0x9   : > { %v371_v51 = vld [vmem:[%s1960_s6] sm:$0xf] (!%p315_p2) }
   0xa   : > { %v1662_v57 = vsub.s32 (!%p315_p2), 0, %v521_v54  ;;  %v518_v58 = vld [vmem:[%s1963_s9] sm:$0x3] (!%p315_p2)  ;;  %v1667_v59 = vsub.s32 (!%p315_p2), 1, %v521_v54  ;;  %v1374_v60 = vld [vmem:[%s1963_s9 + $0x2] sm:$0x3] (!%p315_p2) }
   0xb   : > { %vm515_vm2 = vcmp.lt.s32.totalorder (!%p315_p2), %v1660_v55, 17  ;;  %vm538_vm3 = vcmp.lt.s32.totalorder (!%p315_p2), %v1660_v55, 16  ;;  %vm562_vm4 = vcmp.lt.s32.totalorder (!%p315_p2), %v1660_v55, 15  ;;  %vm586_vm5 = vcmp.lt.s32.totalorder (!%p315_p2), %v1660_v55, 1 }
   0xc   : > { %v523_v62 = vrot.slane (!%p315_p2), %v518_v58, %v1662_v57  ;;  %v527_v63 = vrot.slane (!%p315_p2), %v518_v58, %v1667_v59  ;;  %v551_v1 = vrot.slane (!%p315_p2), %v1374_v60, %v1667_v59  ;;  %vm612_vm6 = vcmp.lt.s32.totalorder (!%p315_p2), %v1660_v55, 127 }
   0xd   : > { %s1969_s15 = smov (!%p355_p3, %s1365_s15), 3  ;;  %vm636_vm7 = vcmp.lt.s32.totalorder %v1660_v55, 113  ;;  %vm660_vm8 = vcmp.lt.s32.totalorder %v1660_v55, 112  ;;  %vm684_vm9 = vcmp.lt.s32.totalorder %v1660_v55, 111 }
   0xe   : > { %s1397_s18 = sshll.u32 %s1969_s15, 3  ;;  %s1967_s15 = smov 111  }
   0xf   : > { %s359_s21 = scalar_lea.vmem %s1954_s0, %s1397_s18 }
  0x10   : > { %v378_v3 = vld [vmem:[%s359_s21] sm:$0xff]  ;;  %v1382_v4 = vld [vmem:[%s359_s21 + $0x8] sm:$0xff] }
  0x11   : > { %v385_v5 = vcombine.high %v378_v3, %v378_v3  ;;  %v863_v6 = vcombine.high %v1382_v4, %v1382_v4 }
  0x13   : > { %1371 = vmatprep.subr.msk.mxu1 %vm390_vm0, %v385_v5  ;;  %1383 = vmatprep.subr.msk.mxu0 %vm390_vm0, %v863_v6 }
  0x14   : > { %1372 = vmatpush1.msk.msra.mxu1 %vm390_vm0, %v378_v3  ;;  %1384 = vmatpush1.msk.msra.mxu0 %vm390_vm0, %v1382_v4 }
  0x15   : > { %1373 = vmatmul.mubr.msk.f32.vlgmr.msra.gmra.mrb[0].mxu1 %vm386_vm1, %v368_v7  ;;  %1385 = vmatmul.mubr.msk.f32.vlgmr.msra.gmra.mrb[0].mxu0 %vm386_vm1, %v368_v7 }
  0x16   : > { %795 = vmatprep.mubr.f32.mxu1 %v1496_v0  ;;  %1242 = vmatprep.mubr.f32.mxu0 %v1496_v0  ;;  %v547_v0 = vrot.slane %v1374_v60, %v1662_v57  ;;  %v645_v60 = vrot.slane %v1378_v52, %v1662_v57 }
  0x87   : > { %v1588_v8 = vpop.permute.xlu0 %381 }
  0xe8   : > { %v461_v9 = vpop.f32.mrb[0].mxu1  ;;  %v1590_v10 = vpop.f32.mrb[0].mxu0 }
  0xe9   : > { %v462_v11 = vadd.f32 %v461_v9, %v1588_v8  ;;  %v463_v12 = vpop.f32.mrb[1].mxu1  ;;  %v1593_v13 = vpop.f32.mrb[1].mxu0 }
  0xea   : > { %v464_v14 = vadd.f32 %v463_v12, %v1588_v8 }
  0xeb   : > { %v477_v15 = vmul.f32 %v462_v11, %v462_v11 }
  0xec   : > { %v466_v16 = vadd.f32 %v464_v14, %v462_v11  ;;  %v478_v17 = vmul.f32 %v464_v14, %v464_v14 }
  0xee   : > { %467 = vadd.xlane.f32.xlu0 %v466_v16  ;;  %v479_v18 = vadd.f32 %v478_v17, %v477_v15  ;;  %v1375_v17 = vld [vmem:[%s1963_s9 + $0x4] sm:$0x3] }
  0xf0   : > { %480 = vadd.xlane.f32.xlu1 %v479_v18  ;;  %v1376_v18 = vld [vmem:[%s1963_s9 + $0x6] sm:$0x3] }
 0x17b   : > { %v468_v19 = vpop.xlane.xlu0 %467 }
 0x17c   : > { %v469_v20 = vrot.slane %v468_v19, 4 }
 0x17d   : > { %v481_v21 = vpop.xlane.xlu1 %480 }
 0x17e   : > { %v470_v22 = vadd.f32 %v469_v20, %v468_v19  ;;  %v482_v23 = vrot.slane %v481_v21, 4  ;;  %v571_v20 = vrot.slane %v1375_v17, %v1662_v57 }
 0x180   : > { %v471_v24 = vrot.slane %v470_v22, 2  ;;  %v483_v25 = vadd.f32 %v482_v23, %v481_v21  ;;  %v595_v23 = vrot.slane %v1376_v18, %v1662_v57 }
 0x182   : > { %v484_v26 = vrot.slane %v483_v25, 2  ;;  %v472_v27 = vadd.f32 %v471_v24, %v470_v22  ;;  %v575_v22 = vrot.slane %v1375_v17, %v1667_v59  ;;  %v599_v24 = vrot.slane %v1376_v18, %v1667_v59 }
 0x184   : > { %v473_v28 = vrot.slane %v472_v27, 1  ;;  %v485_v29 = vadd.f32 %v484_v26, %v483_v25 }
 0x186   : > { %v474_v30 = vadd.f32 %v473_v28, %v472_v27  ;;  %v486_v31 = vrot.slane %v485_v29, 1 }
 0x188   : > { %1431 = vpush %v474_v30  ;;  %v487_v32 = vadd.f32 %v486_v31, %v485_v29 }
 0x18a   : > { %1433 = vpush %v487_v32 }
 0x1b9   : > { %s1432_s24 = spop %1431 }
 0x1ba   : > { %s476_s25 = smul.f32 0.00048828125, %s1432_s24 }
 0x1bb   : > { %s1434_s26 = spop %1433 }
 0x1bc   : > { %s490_s27 = smul.f32 %s476_s25, %s476_s25  ;;  %v493_v35 = vstv %s476_s25  ;;  %s1499_s25 = smov 15  }
 0x1bd   : > { %s489_s28 = smul.f32 0.00048828125, %s1434_s26  ;;  %v494_v36 = vsub.f32 %v462_v11, %v493_v35  ;;  %v495_v37 = vsub.f32 %v464_v14, %v493_v35  ;;  %s1500_s26 = smov 17  }
 0x1bf   : > { %s491_s29 = ssub.f32 %s489_s28, %s490_s27  ;;  %s1501_s27 = smov 113  }
 0x1c0   : > { %s1502_s28 = smov 112  }
 0x1c1   : > { %s492_s11 = smax.f32 %s1498_s30, %s491_s29  ;;  %s1503_s29 = smov 16  }
 0x1c2   : > { %s496_s12 = sadd.f32 1e-05, %s492_s11  ;;  %s1965_s11 = smov 111  }
 0x1c4   : > { %v497_v33 = vstv %s496_s12  ;;  %s1505_s12 = smov 1  }
 0x1c5   : > { %1480 = vrsqrt.f32 %v497_v33 }
 0x1cf   : > { %v1481_v34 = vpop.eup %1480 }
 0x1d0   : > { %1435 = vpush %v1481_v34  ;;  %v1377_v34 = vld [vmem:[%s1963_s9 + $0xa] sm:$0x3] }
 0x201   : > { %s1436_s14 = spop %1435 }
 0x202   : > { %v500_v40 = vstv %s1436_s14  ;;  %s1506_s14 = smov 127  }
 0x203   : > { %v501_v41 = vmul.f32 %v500_v40, %v494_v36  ;;  %v502_v42 = vmul.f32 %v500_v40, %v495_v37  ;;  %v621_v40 = vrot.slane %v1377_v34, %v1662_v57 }
 0x205   : > { %v503_v45 = vmul.f32 %v501_v41, %v1600_v38  ;;  %v504_v46 = vmul.f32 %v502_v42, %v1605_v39  ;;  %v625_v41 = vrot.slane %v1377_v34, %v1667_v59 }
 0x207   : > { %v505_v47 = vadd.f32 %v503_v45, %v1610_v43  ;;  %v506_v48 = vadd.f32 %v504_v46, %v1615_v44 }
 0x209   : > { %v1621_v49 = vmax.f32 %v505_v47, 0.0  ;;  %v1623_v50 = vmax.f32 %v506_v48, 0.0 }
 0x20b   : > { %560 = vrot.lane.b32.xlu0 %v1623_v50, %s1499_s25  ;;  %509 = vrot.lane.b32.xlu1 %v1621_v49, %s1500_s26 }
 0x20f   : > { %634 = vrot.lane.b32.xlu0 %v1623_v50, %s1501_s27  ;;  %511 = vrot.lane.b32.xlu1 %v1623_v50, %s1500_s26 }
 0x213   : > { %658 = vrot.lane.b32.xlu0 %v1623_v50, %s1502_s28  ;;  %534 = vrot.lane.b32.xlu1 %v1621_v49, %s1503_s29 }
 0x217   : > { %682 = vrot.lane.b32.xlu0 %v1623_v50, %s1965_s11  ;;  %536 = vrot.lane.b32.xlu1 %v1623_v50, %s1503_s29 }
 0x21b   : > { %558 = vrot.lane.b32.xlu1 %v1621_v49, %s1499_s25 }
 0x21f   : > { %582 = vrot.lane.b32.xlu1 %v1621_v49, %s1505_s12 }
 0x223   : > { %584 = vrot.lane.b32.xlu1 %v1623_v50, %s1505_s12 }
 0x227   : > { %608 = vrot.lane.b32.xlu1 %v1621_v49, %s1506_s14 }
 0x22b   : > { %610 = vrot.lane.b32.xlu1 %v1623_v50, %s1506_s14 }
 0x22f   : > { %632 = vrot.lane.b32.xlu1 %v1621_v49, %s1501_s27 }
 0x233   : > { %656 = vrot.lane.b32.xlu1 %v1621_v49, %s1502_s28 }
 0x237   : > { %680 = vrot.lane.b32.xlu1 %v1621_v49, %s1965_s11 }
 0x23b   : > { %724 = vperm.xlu1 %1475, %v371_v51  }
 0x27d   : > { %v510_v53 = vpop.permute.xlu1 %509  ;;  %v561_v21 = vpop.permute.xlu0 %560 }
 0x281   : > { %v512_v56 = vpop.permute.xlu1 %511  ;;  %v635_v42 = vpop.permute.xlu0 %634 }
 0x282   : > { %v516_v2 = vsel %vm515_vm2, %v510_v53, %v512_v56  ;;  %v517_v3 = vsel %vm515_vm2, %v512_v56, %v510_v53  ;;  %v1379_v53 = vld [vmem:[%s1963_s9 + $0xe] sm:$0x3] }
 0x283   : > { %v530_v7 = vmul.f32 %v523_v62, %v517_v3  ;;  %v531_v9 = vmul.f32 %v527_v63, %v516_v2  ;;  %v649_v62 = vrot.slane %v1378_v52, %v1667_v59  ;;  %v669_v63 = vrot.slane %v1379_v53, %v1662_v57 }
 0x285   : > { %v535_v61 = vpop.permute.xlu1 %534 }
 0x289   : > { %v537_v4 = vpop.permute.xlu1 %536 }
 0x28a   : > { %v539_v5 = vsel %vm538_vm3, %v535_v61, %v537_v4  ;;  %v540_v6 = vsel %vm538_vm3, %v537_v4, %v535_v61  ;;  %v659_v61 = vpop.permute.xlu0 %658 }
 0x28b   : > { %v554_v11 = vmul.f32 %v547_v0, %v540_v6  ;;  %v555_v12 = vmul.f32 %v551_v1, %v539_v5  ;;  %v673_v0 = vrot.slane %v1379_v53, %v1667_v59 }
 0x28d   : > { %v1401_v14 = vpack.c.bf16 %v554_v11, %v530_v7  ;;  %v559_v15 = vpop.permute.xlu1 %558  ;;  %v1399_v16 = vpack.c.bf16 %v555_v12, %v531_v9 }
 0x28e   : > { %v563_v25 = vsel %vm562_vm4, %v559_v15, %v561_v21  ;;  %v564_v26 = vsel %vm562_vm4, %v561_v21, %v559_v15  ;;  %v683_v12 = vpop.permute.xlu0 %682 }
 0x28f   : > { %1400 = vmatprep.subr.bf16.mxu1 %v1399_v16  ;;  %v578_v30 = vmul.f32 %v571_v20, %v564_v26  ;;  %v579_v31 = vmul.f32 %v575_v22, %v563_v25  ;;  %v1751_v22 = vld [vmem:[%s1959_s5] sm:$0xf] }
 0x290   : > { %1402 = vmatpush1.bf16.msra.mxu1 %v1401_v14 }
 0x291   : > { %v583_v19 = vpop.permute.xlu1 %582 }
 0x295   : > { %v585_v27 = vpop.permute.xlu1 %584 }
 0x296   : > { %v587_v28 = vsel %vm586_vm5, %v583_v19, %v585_v27  ;;  %v588_v29 = vsel %vm586_vm5, %v585_v27, %v583_v19 }
 0x297   : > { %v602_v32 = vmul.f32 %v595_v23, %v588_v29  ;;  %v603_v33 = vmul.f32 %v599_v24, %v587_v28 }
 0x299   : > { %v1405_v35 = vpack.c.bf16 %v602_v32, %v578_v30  ;;  %v609_v36 = vpop.permute.xlu1 %608  ;;  %v1403_v37 = vpack.c.bf16 %v603_v33, %v579_v31  ;;  %v1773_v32 = vadd.f32 %v1590_v10, %v1588_v8  ;;  %v1777_v33 = vadd.f32 %v1593_v13, %v1588_v8 }
 0x29b   : > { %1404 = vmatprep.subr.bf16.mxu1 %v1403_v37  ;;  %v951_v10 = vmul.f32 %v1777_v33, %v1777_v33 }
 0x29c   : > { %1406 = vmatpush1.bf16.msra.mxu1 %v1405_v35 }
 0x29d   : > { %v611_v45 = vpop.permute.xlu1 %610 }
 0x29e   : > { %v613_v46 = vsel %vm612_vm6, %v609_v36, %v611_v45  ;;  %v614_v47 = vsel %vm612_vm6, %v611_v45, %v609_v36 }
 0x29f   : > { %v628_v48 = vmul.f32 %v621_v40, %v613_v46  ;;  %v629_v51 = vmul.f32 %v625_v41, %v614_v47  ;;  %v939_v40 = vadd.f32 %v1777_v33, %v1773_v32  ;;  %v950_v41 = vmul.f32 %v1773_v32, %v1773_v32 }
 0x2a1   : > { %v1409_v54 = vpack.c.bf16 %v628_v48, %v1621_v49  ;;  %v633_v56 = vpop.permute.xlu1 %632  ;;  %v1407_v58 = vpack.c.bf16 %v629_v51, %v1623_v50  ;;  %v1380_v49 = vld [vmem:[%s1963_s9 + $0x10] sm:$0x3]  ;;  %v952_v8 = vadd.f32 %v951_v10, %v950_v41 }
 0x2a2   : > { %v637_v1 = vsel %vm636_vm7, %v633_v56, %v635_v42  ;;  %v638_v50 = vsel %vm636_vm7, %v635_v42, %v633_v56  ;;  %v697_v5 = vrot.slane %v1380_v49, %v1667_v59  ;;  %v693_v17 = vrot.slane %v1380_v49, %v1662_v57 }
 0x2a3   : > { %1408 = vmatprep.subr.bf16.mxu1 %v1407_v58  ;;  %v652_v6 = vmul.f32 %v645_v60, %v637_v1  ;;  %v653_v7 = vmul.f32 %v649_v62, %v638_v50 }
 0x2a4   : > { %1410 = vmatpush1.bf16.msra.mxu1 %v1409_v54 }
 0x2a5   : > { %v657_v2 = vpop.permute.xlu1 %656 }
 0x2a6   : > { %v661_v3 = vsel %vm660_vm8, %v657_v2, %v659_v61  ;;  %v662_v4 = vsel %vm660_vm8, %v659_v61, %v657_v2 }
 0x2a7   : > { %v676_v9 = vmul.f32 %v669_v63, %v661_v3  ;;  %v677_v11 = vmul.f32 %v673_v0, %v662_v4 }
 0x2a9   : > { %v1413_v14 = vpack.c.bf16 %v676_v9, %v652_v6  ;;  %v681_v15 = vpop.permute.xlu1 %680  ;;  %v1411_v16 = vpack.c.bf16 %v677_v11, %v653_v7 }
 0x2aa   : > { %v686_v18 = vsel %vm684_vm9, %v683_v12, %v681_v15  ;;  %v685_v19 = vsel %vm684_vm9, %v681_v15, %v683_v12 }
 0x2ab   : > { %v701_v20 = vmul.f32 %v697_v5, %v686_v18  ;;  %1412 = vmatprep.subr.bf16.mxu1 %v1411_v16  ;;  %v700_v21 = vmul.f32 %v693_v17, %v685_v19  ;;  %v1791_v16 = vld [vmem:[%s1961_s7] sm:$0xff] }
 0x2ac   : > { %1414 = vmatpush1.bf16.msra.mxu1 %v1413_v14  ;;  %v1796_v17 = vld [vmem:[%s1962_s8] sm:$0xff] }
 0x2ad   : > { %747 = vmatprep.subr.mxu1 %v701_v20  ;;  %v1802_v20 = vcombine.high %v1791_v16, %v1791_v16 }
 0x2b0   : > { %748 = vmatpush1.msra.mxu1 %v700_v21 }
 0x2b1   : > { %1381 = vmatmul.mubr.msk.f32.vlgmr.msra.gmra.mrb[2].mxu1 %vm727_vm10, %v1751_v22 }
 0x2ba   : > { %v1755_v23 = vpop.permute.xlu1 %724 }
 0x384   : > { %v797_v24 = vpop.f32.mrb[2].mxu1 }
 0x385   : > { %v1758_v25 = vadd.f32 %v797_v24, %v1755_v23  ;;  %v799_v26 = vpop.f32.mrb[3].mxu1 }
 0x386   : > { %v1761_v27 = vadd.f32 %v799_v26, %v1755_v23 }
 0x387   : > { %v802_v28 = vsel %vm390_vm0, %v1758_v25, 0.0  ;;  %v815_v29 = vmul.f32 %v1758_v25, %v1758_v25 }
 0x388   : > { %v803_v30 = vsel %vm390_vm0, %v1761_v27, 0.0  ;;  %v816_v31 = vmul.f32 %v1761_v27, %v1761_v27 }
 0x389   : > { %v804_v34 = vadd.f32 %v803_v30, %v802_v28  ;;  %v817_v35 = vsel %vm390_vm0, %v815_v29, 0.0  ;;  %v1806_v28 = vcombine.high %v1796_v17, %v1796_v17 }
 0x38a   : > { %v818_v36 = vsel %vm390_vm0, %v816_v31, 0.0 }
 0x38b   : > { %805 = vadd.xlane.f32.xlu0 %v804_v34  ;;  %v819_v37 = vadd.f32 %v818_v36, %v817_v35 }
 0x38d   : > { %820 = vadd.xlane.f32.xlu1 %v819_v37 }
 0x38f   : > { %940 = vadd.xlane.f32.xlu0 %v939_v40 }
 0x393   : > { %953 = vadd.xlane.f32.xlu0 %v952_v8 }
 0x418   : > { %v806_v13 = vpop.xlane.xlu0 %805 }
 0x419   : > { %v807_v42 = vrot.slane %v806_v13, 4 }
 0x41a   : > { %v821_v45 = vpop.xlane.xlu1 %820 }
 0x41b   : > { %v808_v46 = vadd.f32 %v807_v42, %v806_v13  ;;  %v822_v47 = vrot.slane %v821_v45, 4 }
 0x41c   : > { %v941_v62 = vpop.xlane.xlu0 %940 }
 0x41d   : > { %v809_v48 = vrot.slane %v808_v46, 2  ;;  %v823_v51 = vadd.f32 %v822_v47, %v821_v45  ;;  %v942_v0 = vrot.slane %v941_v62, 4 }
 0x41f   : > { %v824_v52 = vrot.slane %v823_v51, 2  ;;  %v810_v53 = vadd.f32 %v809_v48, %v808_v46  ;;  %v943_v1 = vadd.f32 %v942_v0, %v941_v62 }
 0x420   : > { %v954_v63 = vpop.xlane.xlu0 %953 }
 0x421   : > { %v811_v54 = vrot.slane %v810_v53, 1  ;;  %v825_v56 = vadd.f32 %v824_v52, %v823_v51  ;;  %v955_v49 = vrot.slane %v954_v63, 4  ;;  %v944_v2 = vrot.slane %v943_v1, 2 }
 0x423   : > { %v812_v58 = vadd.f32 %v811_v54, %v810_v53  ;;  %v826_v60 = vrot.slane %v825_v56, 1  ;;  %v956_v50 = vadd.f32 %v955_v49, %v954_v63  ;;  %v945_v5 = vadd.f32 %v944_v2, %v943_v1 }
 0x425   : > { %1437 = vpush %v812_v58  ;;  %v827_v61 = vadd.f32 %v826_v60, %v825_v56  ;;  %v957_v3 = vrot.slane %v956_v50, 2  ;;  %v946_v7 = vrot.slane %v945_v5, 1 }
 0x427   : > { %1439 = vpush %v827_v61  ;;  %v958_v6 = vadd.f32 %v957_v3, %v956_v50  ;;  %v947_v12 = vadd.f32 %v946_v7, %v945_v5  ;;  %v1388_v5 = vld [vmem:[%s1963_s9 + $0x6] sm:$0x3] }
 0x429   : > { %v959_v9 = vrot.slane %v958_v6, 1 }
 0x42b   : > { %v960_v14 = vadd.f32 %v959_v9, %v958_v6 }
 0x456   : > { %s1438_s21 = spop %1437 }
 0x457   : > { %s814_s22 = smul.f32 0.0009765625, %s1438_s21 }
 0x458   : > { %s1440_s23 = spop %1439 }
 0x459   : > { %s830_s24 = smul.f32 %s814_s22, %s814_s22  ;;  %v833_v15 = vstv %s814_s22 }
 0x45a   : > { %s829_s16 = smul.f32 0.0009765625, %s1440_s23  ;;  %v834_v18 = vsub.f32 %v1758_v25, %v833_v15  ;;  %v835_v19 = vsub.f32 %v1761_v27, %v833_v15  ;;  %v1059_v15 = vrot.slane %v1388_v5, %v1662_v57 }
 0x45c   : > { %s831_s17 = ssub.f32 %s829_s16, %s830_s24 }
 0x45e   : > { %s832_s19 = smax.f32 %s1498_s30, %s831_s17 }
 0x45f   : > { %s836_s20 = sadd.f32 1e-05, %s832_s19 }
 0x461   : > { %v837_v4 = vstv %s836_s20 }
 0x462   : > { %1482 = vrsqrt.f32 %v837_v4  ;;  %v1387_v4 = vld [vmem:[%s1963_s9 + $0x4] sm:$0x3] }
 0x46c   : > { %v1483_v11 = vpop.eup %1482 }
 0x46d   : > { %1441 = vpush %v1483_v11 }
 0x46e   : > { %1443 = vpush %v947_v12  ;;  %v1037_v12 = vrot.slane %v1387_v4, %v1662_v57 }
 0x46f   : > { %1445 = vpush %v960_v14  ;;  %v1041_v14 = vrot.slane %v1387_v4, %v1667_v59 }
 0x49e   : > { %s1442_s17 = spop %1441 }
 0x49f   : > { %v840_v21 = vstv %s1442_s17  ;;  %s1444_s22 = spop %1443 }
 0x4a0   : > { %v841_v24 = vmul.f32 %v840_v21, %v834_v18  ;;  %v842_v26 = vmul.f32 %v840_v21, %v835_v19  ;;  %s949_s19 = smul.f32 0.00048828125, %s1444_s22  ;;  %s1446_s20 = spop %1445  ;;  %v1063_v18 = vrot.slane %v1388_v5, %v1667_v59  ;;  %v1389_v19 = vld [vmem:[%s1963_s9 + $0xa] sm:$0x3] }
 0x4a1   : > { %s962_s21 = smul.f32 0.00048828125, %s1446_s20  ;;  %s1818_s22 = scalar_lea.vmem %s1964_s10, %s1397_s18 }
 0x4a2   : > { %v846_v25 = vmul.f32 %v841_v24, %v1791_v16  ;;  %v847_v27 = vmul.f32 %v1802_v20, %v842_v26  ;;  %s963_s23 = smul.f32 %s949_s19, %s949_s19  ;;  %v966_v40 = vstv %s949_s19 }
 0x4a3   : > { %v967_v41 = vsub.f32 %v1773_v32, %v966_v40  ;;  %v968_v10 = vsub.f32 %v1777_v33, %v966_v40 }
 0x4a4   : > { %v851_v29 = vadd.f32 %v846_v25, %v1796_v17  ;;  %v852_v30 = vadd.f32 %v1806_v28, %v847_v27  ;;  %s964_s24 = ssub.f32 %s962_s21, %s963_s23 }
 0x4a6   : > { %v853_v31 = vmax.f32 %v851_v29, 0.0  ;;  %v854_v34 = vmax.f32 %v852_v30, 0.0  ;;  %s965_s16 = smax.f32 %s1498_s30, %s964_s24  ;;  %v1083_v29 = vrot.slane %v1389_v19, %v1662_v57  ;;  %v1087_v30 = vrot.slane %v1389_v19, %v1667_v59 }
 0x4a7   : > { %s969_s20 = sadd.f32 1e-05, %s965_s16 }
 0x4a8   : > { %v857_v35 = vcombine.low %v853_v31, %v854_v34 }
 0x4a9   : > { %v970_v36 = vstv %s969_s20 }
 0x4aa   : > { %859 = vst [vmem:[%s1818_s22] sm:$0xff] %v857_v35  ;;  %1484 = vrsqrt.f32 %v970_v36 }
 0x4b4   : > { %v1485_v37 = vpop.eup %1484 }
 0x4b5   : > { %1447 = vpush %v1485_v37 }
 0x4e6   : > { %s1448_s21 = spop %1447 }
 0x4e7   : > { %v973_v8 = vstv %s1448_s21 }
 0x4e8   : > { %v974_v13 = vmul.f32 %v973_v8, %v967_v41  ;;  %v975_v42 = vmul.f32 %v973_v8, %v968_v10 }
 0x4ea   : > { %v976_v45 = vmul.f32 %v974_v13, %v1600_v38  ;;  %v977_v46 = vmul.f32 %v975_v42, %v1605_v39 }
 0x4ec   : > { %v978_v47 = vadd.f32 %v976_v45, %v1610_v43  ;;  %v979_v48 = vadd.f32 %v977_v46, %v1615_v44  ;;  %v988_v43 = vld [vmem:[%s1963_s9] sm:$0x3]  ;;  %v1386_v44 = vld [vmem:[%s1963_s9 + $0x2] sm:$0x3]  ;;  %v1390_v46 = vld [vmem:[%s1963_s9 + $0xc] sm:$0x3] }
 0x4ed   : > { %v993_v53 = vrot.slane %v988_v43, %v1662_v57  ;;  %v997_v54 = vrot.slane %v988_v43, %v1667_v59  ;;  %v1015_v56 = vrot.slane %v1386_v44, %v1662_v57  ;;  %v1019_v58 = vrot.slane %v1386_v44, %v1667_v59 }
 0x4ee   : > { %v1827_v51 = vmax.f32 %v978_v47, 0.0  ;;  %v1829_v52 = vmax.f32 %v979_v48, 0.0  ;;  %v1391_v47 = vld [vmem:[%s1963_s9 + $0xe] sm:$0x3]  ;;  %v1105_v44 = vrot.slane %v1390_v46, %v1662_v57 }
 0x4f0   : > { %984 = vrot.lane.b32.xlu0 %v1829_v52, %s1500_s26  ;;  %982 = vrot.lane.b32.xlu1 %v1827_v51, %s1500_s26 }
 0x4f4   : > { %1026 = vrot.lane.b32.xlu0 %v1827_v51, %s1499_s25  ;;  %1004 = vrot.lane.b32.xlu1 %v1827_v51, %s1503_s29 }
 0x4f8   : > { %1048 = vrot.lane.b32.xlu0 %v1827_v51, %s1505_s12  ;;  %1006 = vrot.lane.b32.xlu1 %v1829_v52, %s1503_s29 }
 0x4fc   : > { %1072 = vrot.lane.b32.xlu0 %v1827_v51, %s1506_s14  ;;  %1028 = vrot.lane.b32.xlu1 %v1829_v52, %s1499_s25 }
 0x500   : > { %1094 = vrot.lane.b32.xlu0 %v1827_v51, %s1501_s27  ;;  %1050 = vrot.lane.b32.xlu1 %v1829_v52, %s1505_s12 }
 0x504   : > { %1116 = vrot.lane.b32.xlu0 %v1827_v51, %s1502_s28  ;;  %1074 = vrot.lane.b32.xlu1 %v1829_v52, %s1506_s14 }
 0x508   : > { %1138 = vrot.lane.b32.xlu0 %v1827_v51, %s1967_s15  ;;  %1096 = vrot.lane.b32.xlu1 %v1829_v52, %s1501_s27 }
 0x50c   : > { %1118 = vrot.lane.b32.xlu1 %v1829_v52, %s1502_s28 }
 0x510   : > { %1140 = vrot.lane.b32.xlu1 %v1829_v52, %s1967_s15 }
 0x562   : > { %v985_v38 = vpop.permute.xlu0 %984  ;;  %v983_v39 = vpop.permute.xlu1 %982 }
 0x563   : > { %v986_v60 = vsel %vm515_vm2, %v983_v39, %v985_v38  ;;  %v987_v61 = vsel %vm515_vm2, %v985_v38, %v983_v39 }
 0x564   : > { %v1000_v1 = vmul.f32 %v993_v53, %v987_v61  ;;  %v1001_v50 = vmul.f32 %v997_v54, %v986_v60  ;;  %v1131_v53 = vrot.slane %v1391_v47, %v1667_v59  ;;  %v1392_v54 = vld [vmem:[%s1963_s9 + $0x10] sm:$0x3] }
 0x565   : > { %v1153_v61 = vrot.slane %v1392_v54, %v1667_v59  ;;  %v1149_v4 = vrot.slane %v1392_v54, %v1662_v57 }
 0x566   : > { %v1027_v32 = vpop.permute.xlu0 %1026  ;;  %v1005_v33 = vpop.permute.xlu1 %1004 }
 0x56a   : > { %v1049_v62 = vpop.permute.xlu0 %1048  ;;  %v1007_v63 = vpop.permute.xlu1 %1006 }
 0x56b   : > { %v1008_v0 = vsel %vm538_vm3, %v1005_v33, %v1007_v63  ;;  %v1009_v49 = vsel %vm538_vm3, %v1007_v63, %v1005_v33  ;;  %v1127_v33 = vrot.slane %v1391_v47, %v1662_v57 }
 0x56c   : > { %v1022_v2 = vmul.f32 %v1015_v56, %v1009_v49  ;;  %v1023_v3 = vmul.f32 %v1019_v58, %v1008_v0 }
 0x56e   : > { %v1417_v6 = vpack.c.bf16 %v1022_v2, %v1000_v1  ;;  %v1029_v7 = vpop.permute.xlu1 %1028  ;;  %v1415_v9 = vpack.c.bf16 %v1023_v3, %v1001_v50  ;;  %v1073_v11 = vpop.permute.xlu0 %1072 }
 0x56f   : > { %v1030_v21 = vsel %vm562_vm4, %v1027_v32, %v1029_v7  ;;  %v1031_v24 = vsel %vm562_vm4, %v1029_v7, %v1027_v32  ;;  %v1109_v32 = vrot.slane %v1390_v46, %v1667_v59 }
 0x570   : > { %1416 = vmatprep.subr.bf16.mxu0 %v1415_v9  ;;  %v1044_v31 = vmul.f32 %v1037_v12, %v1031_v24  ;;  %v1045_v34 = vmul.f32 %v1041_v14, %v1030_v21 }
 0x571   : > { %1418 = vmatpush1.bf16.msra.mxu0 %v1417_v6 }
 0x572   : > { %v1051_v26 = vpop.permute.xlu1 %1050  ;;  %v1095_v37 = vpop.permute.xlu0 %1094 }
 0x573   : > { %v1052_v25 = vsel %vm586_vm5, %v1049_v62, %v1051_v26  ;;  %v1053_v27 = vsel %vm586_vm5, %v1051_v26, %v1049_v62 }
 0x574   : > { %v1066_v35 = vmul.f32 %v1059_v15, %v1053_v27  ;;  %v1067_v36 = vmul.f32 %v1063_v18, %v1052_v25 }
 0x576   : > { %v1421_v40 = vpack.c.bf16 %v1066_v35, %v1044_v31  ;;  %v1075_v41 = vpop.permute.xlu1 %1074  ;;  %v1419_v10 = vpack.c.bf16 %v1067_v36, %v1045_v34  ;;  %v1117_v43 = vpop.permute.xlu0 %1116 }
 0x577   : > { %v1076_v8 = vsel %vm612_vm6, %v1073_v11, %v1075_v41  ;;  %v1077_v13 = vsel %vm612_vm6, %v1075_v41, %v1073_v11 }
 0x578   : > { %v1090_v42 = vmul.f32 %v1083_v29, %v1076_v8  ;;  %v1091_v45 = vmul.f32 %v1087_v30, %v1077_v13  ;;  %1420 = vmatprep.subr.bf16.mxu0 %v1419_v10 }
 0x579   : > { %1422 = vmatpush1.bf16.msra.mxu0 %v1421_v40 }
 0x57a   : > { %v1425_v48 = vpack.c.bf16 %v1090_v42, %v1827_v51  ;;  %v1097_v38 = vpop.permute.xlu1 %1096  ;;  %v1423_v39 = vpack.c.bf16 %v1091_v45, %v1829_v52  ;;  %v1139_v1 = vpop.permute.xlu0 %1138 }
 0x57b   : > { %v1098_v51 = vsel %vm636_vm7, %v1095_v37, %v1097_v38  ;;  %v1099_v52 = vsel %vm636_vm7, %v1097_v38, %v1095_v37 }
 0x57c   : > { %1424 = vmatprep.subr.bf16.mxu0 %v1423_v39  ;;  %v1112_v62 = vmul.f32 %v1105_v44, %v1098_v51  ;;  %v1113_v63 = vmul.f32 %v1109_v32, %v1099_v52 }
 0x57d   : > { %1426 = vmatpush1.bf16.msra.mxu0 %v1425_v48 }
 0x57e   : > { %v1119_v56 = vpop.permute.xlu1 %1118 }
 0x57f   : > { %v1120_v58 = vsel %vm660_vm8, %v1117_v43, %v1119_v56  ;;  %v1121_v60 = vsel %vm660_vm8, %v1119_v56, %v1117_v43 }
 0x580   : > { %v1134_v0 = vmul.f32 %v1127_v33, %v1120_v58  ;;  %v1135_v49 = vmul.f32 %v1131_v53, %v1121_v60 }
 0x582   : > { %v1429_v50 = vpack.c.bf16 %v1134_v0, %v1112_v62  ;;  %v1141_v2 = vpop.permute.xlu1 %1140  ;;  %v1427_v3 = vpack.c.bf16 %v1135_v49, %v1113_v63 }
 0x583   : > { %v1143_v5 = vsel %vm684_vm9, %v1141_v2, %v1139_v1  ;;  %v1142_v6 = vsel %vm684_vm9, %v1139_v1, %v1141_v2 }
 0x584   : > { %v1157_v7 = vmul.f32 %v1153_v61, %v1143_v5  ;;  %1428 = vmatprep.subr.bf16.mxu0 %v1427_v3  ;;  %v1156_v59 = vmul.f32 %v1149_v4, %v1142_v6 }
 0x585   : > { %1430 = vmatpush1.bf16.msra.mxu0 %v1429_v50 }
 0x586   : > { %1194 = vmatprep.subr.mxu0 %v1157_v7 }
 0x589   : > { %1195 = vmatpush1.msra.mxu0 %v1156_v59 }
 0x58a   : > { %1393 = vmatmul.mubr.msk.f32.vlgmr.msra.gmra.mrb[2].mxu0 %vm727_vm10, %v1751_v22 }
 0x65d   : > { %v1244_v9 = vpop.f32.mrb[2].mxu0 }
 0x65e   : > { %v1245_v11 = vadd.f32 %v1244_v9, %v1755_v23  ;;  %v1246_v12 = vpop.f32.mrb[3].mxu0 }
 0x65f   : > { %v1247_v57 = vadd.f32 %v1246_v12, %v1755_v23 }
 0x660   : > { %v1249_v14 = vsel %vm390_vm0, %v1245_v11, 0.0  ;;  %v1262_v15 = vmul.f32 %v1245_v11, %v1245_v11 }
 0x661   : > { %v1250_v55 = vsel %vm390_vm0, %v1247_v57, 0.0  ;;  %v1263_v18 = vmul.f32 %v1247_v57, %v1247_v57 }
 0x662   : > { %v1251_v19 = vadd.f32 %v1250_v55, %v1249_v14  ;;  %v1264_v21 = vsel %vm390_vm0, %v1262_v15, 0.0 }
 0x663   : > { %v1265_v24 = vsel %vm390_vm0, %v1263_v18, 0.0 }
 0x664   : > { %1252 = vadd.xlane.f32.xlu0 %v1251_v19  ;;  %v1266_v26 = vadd.f32 %v1265_v24, %v1264_v21 }
 0x666   : > { %1267 = vadd.xlane.f32.xlu1 %v1266_v26 }
 0x6f1   : > { %v1253_v22 = vpop.xlane.xlu0 %1252 }
 0x6f2   : > { %v1254_v25 = vrot.slane %v1253_v22, 4 }
 0x6f3   : > { %v1268_v27 = vpop.xlane.xlu1 %1267 }
 0x6f4   : > { %v1255_v29 = vadd.f32 %v1254_v25, %v1253_v22  ;;  %v1269_v30 = vrot.slane %v1268_v27, 4 }
 0x6f6   : > { %v1256_v23 = vrot.slane %v1255_v29, 2  ;;  %v1270_v31 = vadd.f32 %v1269_v30, %v1268_v27 }
 0x6f8   : > { %v1257_v34 = vadd.f32 %v1256_v23, %v1255_v29  ;;  %v1271_v35 = vrot.slane %v1270_v31, 2 }
 0x6fa   : > { %v1272_v36 = vadd.f32 %v1271_v35, %v1270_v31  ;;  %v1258_v37 = vrot.slane %v1257_v34, 1 }
 0x6fc   : > { %v1259_v40 = vadd.f32 %v1258_v37, %v1257_v34  ;;  %v1273_v41 = vrot.slane %v1272_v36, 1 }
 0x6fe   : > { %1449 = vpush %v1259_v40  ;;  %v1274_v10 = vadd.f32 %v1273_v41, %v1272_v36 }
 0x700   : > { %1451 = vpush %v1274_v10 }
 0x72f   : > { %s1450_s15 = spop %1449 }
 0x730   : > { %s1261_s18 = smul.f32 0.0009765625, %s1450_s15 }
 0x731   : > { %s1452_s25 = spop %1451 }
 0x732   : > { %s1277_s26 = smul.f32 %s1261_s18, %s1261_s18  ;;  %v1280_v42 = vstv %s1261_s18 }
 0x733   : > { %s1276_s29 = smul.f32 0.0009765625, %s1452_s25  ;;  %v1281_v45 = vsub.f32 %v1245_v11, %v1280_v42  ;;  %v1282_v46 = vsub.f32 %v1247_v57, %v1280_v42 }
 0x735   : > { %s1278_s27 = ssub.f32 %s1276_s29, %s1277_s26 }
 0x737   : > { %s1279_s28 = smax.f32 %s1498_s30, %s1278_s27 }
 0x738   : > { %s1283_s11 = sadd.f32 1e-05, %s1279_s28 }
 0x73a   : > { %v1284_v8 = vstv %s1283_s11 }
 0x73b   : > { %1486 = vrsqrt.f32 %v1284_v8 }
 0x745   : > { %v1487_v13 = vpop.eup %1486 }
 0x746   : > { %1453 = vpush %v1487_v13 }
 0x777   : > { %s1454_s12 = spop %1453 }
 0x778   : > { %v1287_v47 = vstv %s1454_s12 }
 0x779   : > { %v1288_v48 = vmul.f32 %v1287_v47, %v1281_v45  ;;  %v1289_v38 = vmul.f32 %v1287_v47, %v1282_v46 }
 0x77b   : > { %v1290_v39 = vmul.f32 %v1288_v48, %v1791_v16  ;;  %v1291_v43 = vmul.f32 %v1289_v38, %v1802_v20 }
 0x77d   : > { %v1292_v44 = vadd.f32 %v1290_v39, %v1796_v17  ;;  %v1293_v32 = vadd.f32 %v1291_v43, %v1806_v28 }
 0x77f   : > { %v1294_v33 = vmax.f32 %v1292_v44, 0.0  ;;  %v1295_v53 = vmax.f32 %v1293_v32, 0.0 }
 0x781   : > { %v1298_v54 = vcombine.low %v1294_v33, %v1295_v53 }
 0x783   : > { %1394 = vst [vmem:[%s1818_s22 + $0x8] sm:$0xff] %v1298_v54 }
 0x784 PF: > { %s20_s13 = sadd.s32 1, %s1494_s13  }
 0x785   : > { %p17_p4 = scmp.ge.s32.totalorder %s20_s13, 4  }
 0x787   :  { %19 = sbr.rel (!%p17_p4) target bundleno = 1 (0x1), region = 99 }

</bundles_post_ra>
